<compile_context>
chip_gen: v5e
topology: v5e:2x2
jax: 0.10.0
libtpu: 0.0.40
codegen_flags: <defaults>
</compile_context>

<pallas_src>
import jax
import jax.numpy as jnp
from jax import lax
from jax.experimental import pallas as pl
from jax.experimental.pallas import tpu as pltpu

EPS = 1e-5          # BatchNorm eps (torch default)
LANE = 128          # TPU lane width


def _round_up(x, m):
    return (x + m - 1) // m * m


# ---------------------------------------------------------------------------
# Pallas kernel: 3x3 stride-1 convolution on a halo-carrying row tile, plus
# per-tile BatchNorm partial statistics (sum, sum of squares).
# ---------------------------------------------------------------------------
def _conv3x3_stats_kernel(x_ref, w_ref, y_ref, stats_ref):
    # x_ref     : (1, TH+2, W+2, Cin)  zero-padded input tile incl. 1-row halo
    # w_ref     : (9*Cin, Cout)        im2col-flattened weights ((kh, kw, cin))
    # y_ref     : (1, TH,  W,  Cout)   raw conv output (pre-BN, bias-free)
    # stats_ref : (1, 2, Cout)         per-tile [sum(y); sum(y*y)] over pixels
    _, th, w, cout = y_ref.shape
    cin = x_ref.shape[-1]

    x = x_ref[0]                                            # (TH+2, W+2, Cin)
    # im2col: put the 9 taps side-by-side on the lane axis (Cin is padded to a
    # multiple of 128, so every concat offset is lane aligned), then run ONE
    # MXU matmul with K = 9*Cin.
    cols = jnp.concatenate(
        [x[kh:kh + th, kw:kw + w, :] for kh in range(3) for kw in range(3)],
        axis=-1,
    ).reshape(th * w, 9 * cin)
    y = jnp.dot(cols, w_ref[...], preferred_element_type=jnp.float32)

    y_ref[0] = y.reshape(th, w, cout)
    s1 = jnp.sum(y, axis=0, keepdims=True)                  # (1, Cout)
    s2 = jnp.sum(y * y, axis=0, keepdims=True)              # (1, Cout)
    stats_ref[0] = jnp.concatenate([s1, s2], axis=0)        # (2, Cout)


def _vmem_limit_bytes(th, w, cin_p, cout_p):
    """Scoped-VMEM request derived from the tile sizes (with headroom)."""
    f32 = 4
    x_tile = (th + 2) * _round_up(w + 2, 8) * cin_p * f32
    w_buf = 9 * cin_p * cout_p * f32
    y_tile = th * _round_up(w, 8) * cout_p * f32
    st_tile = 8 * cout_p * f32
    cols = th * w * 9 * cin_p * f32
    est = 2 * (x_tile + w_buf + y_tile + st_tile) + 3 * cols   # 2x = double buffers
    return int(min(max(2 * est, 16 * 1024 * 1024), 64 * 1024 * 1024))


def conv3x3_with_stats(x_nhwc, w_hwio, *, tile_h=8):
    """Bias-free 3x3 / stride-1 / pad-1 conv + BatchNorm partial statistics.

    x_nhwc may carry zero-valued padding channels beyond w_hwio's input-channel
    count (they are matched with zero weights).  Returns
      y    : (B, H, W, Cout_p) raw conv output, Cout_p = round_up(Cout, 128)
      mean : (Cout_p,) per-channel mean over B*H*W
      var  : (Cout_p,) per-channel biased variance over B*H*W
    """
    B, H, W, cx = x_nhwc.shape
    kin, cout = w_hwio.shape[2], w_hwio.shape[3]
    assert kin <= cx, (kin, cx)

    cin_p = _round_up(cx, LANE)
    cout_p = _round_up(cout, LANE)

    th = max(1, min(tile_h, H))
    while H % th:                       # pick a row tile that divides H
        th -= 1
    n_h = H // th

    # Lane-dense channel padding (zeros) for activations and weights.
    xq = jnp.pad(x_nhwc, ((0, 0), (0, 0), (0, 0), (0, cin_p - cx)))
    wq = jnp.pad(w_hwio, ((0, 0), (0, 0), (0, cin_p - kin), (0, cout_p - cout)))
    w_flat = wq.reshape(9 * cin_p, cout_p)

    # conv padding=1, then materialize each row tile together with its 1-row
    # halo so grid blocks never overlap (no padded scratch inside the kernel).
    xp = jnp.pad(xq, ((0, 0), (1, 1), (1, 1), (0, 0)))
    rows = (jnp.arange(n_h) * th)[:, None] + jnp.arange(th + 2)[None, :]
    x_tiles = xp[:, rows].reshape(B * n_h, th + 2, W + 2, cin_p)

    n_tiles = B * n_h
    y_tiled, stats = pl.pallas_call(
        _conv3x3_stats_kernel,
        out_shape=(
            jax.ShapeDtypeStruct((n_tiles, th, W, cout_p), jnp.float32),
            jax.ShapeDtypeStruct((n_tiles, 2, cout_p), jnp.float32),
        ),
        grid=(n_tiles,),
        in_specs=[
            pl.BlockSpec((1, th + 2, W + 2, cin_p), lambda i: (i, 0, 0, 0)),
            pl.BlockSpec((9 * cin_p, cout_p), lambda i: (0, 0)),
        ],
        out_specs=(
            pl.BlockSpec((1, th, W, cout_p), lambda i: (i, 0, 0, 0)),
            pl.BlockSpec((1, 2, cout_p), lambda i: (i, 0, 0)),
        ),
        compiler_params=pltpu.CompilerParams(
            dimension_semantics=("parallel",),
            vmem_limit_bytes=_vmem_limit_bytes(th, W, cin_p, cout_p),
        ),
    )(x_tiles, w_flat)

    y = y_tiled.reshape(B, H, W, cout_p)
    n = B * H * W
    tot = jnp.sum(stats, axis=0)                    # (2, Cout_p)
    mean = tot[0] / n
    var = jnp.maximum(tot[1] / n - mean * mean, 0.0)
    return y, mean, var


def _bn_affine_relu(y, gamma, beta, mean, var):
    """Train-mode BatchNorm folded into a single scale/shift, then ReLU."""
    cp = y.shape[-1]
    g = jnp.pad(gamma, (0, cp - gamma.shape[0]))
    b = jnp.pad(beta, (0, cp - beta.shape[0]))
    scale = g * lax.rsqrt(var + EPS)
    shift = b - mean * scale
    return jnp.maximum(y * scale + shift, 0.0)


def _upsample_matrix(n_in):
    """Interp matrix of torch Upsample(scale_factor=2, bilinear, align_corners=True)."""
    n_out = 2 * n_in
    if n_in == 1:
        return jnp.ones((n_out, 1), jnp.float32)
    src = jnp.arange(n_out, dtype=jnp.float32) * (n_in - 1) / (n_out - 1)
    i0 = jnp.clip(jnp.floor(src).astype(jnp.int32), 0, n_in - 2)
    frac = src - i0.astype(jnp.float32)
    rows = jnp.arange(n_out)
    m = jnp.zeros((n_out, n_in), jnp.float32)
    m = m.at[rows, i0].add(1.0 - frac)
    m = m.at[rows, i0 + 1].add(frac)
    return m


def _bilinear_up2x_nhwc(x):
    _, H, W, _ = x.shape
    mh, mw = _upsample_matrix(H), _upsample_matrix(W)
    x = jnp.einsum('oh,bhwc->bowc', mh, x, precision=lax.Precision.HIGHEST)
    return jnp.einsum('ow,bhwc->bhoc', mw, x, precision=lax.Precision.HIGHEST)


def unet_up(x1_nchw, x2_nchw, params, *, tile_h=8):
    """Forward pass of Unet_Up(bilinear=True) with train-mode BatchNorm."""
    w1, b1, g1, be1, w2, b2, g2, be2 = params
    # Conv biases cancel exactly under train-mode BatchNorm mean subtraction.
    del b1, b2
    out_channel = w2.shape[-1]

    x1 = jnp.transpose(x1_nchw, (0, 2, 3, 1)).astype(jnp.float32)   # NHWC
    x2 = jnp.transpose(x2_nchw, (0, 2, 3, 1)).astype(jnp.float32)

    # self.up: bilinear 2x upsample, align_corners=True
    x1u = _bilinear_up2x_nhwc(x1)

    # F.pad exactly as the original module writes it (its diffx/diffy are
    # swapped w.r.t. the axes; with matching skip shapes both are zero anyway).
    H, W = x2.shape[1], x2.shape[2]
    diffx = W - x1u.shape[2]            # torch: x2.shape[3] - x1.shape[3]
    diffy = H - x1u.shape[1]            # torch: x2.shape[2] - x1.shape[2]
    x1u = jnp.pad(x1u, ((0, 0),
                        (diffx // 2, diffx - diffx // 2),   # H padded by "diffx"
                        (diffy // 2, diffy - diffy // 2),   # W padded by "diffy"
                        (0, 0)))

    x = jnp.concatenate([x2, x1u], axis=-1)   # torch.concat([x2, x1], dim=1)

    # Double_Conv: conv -> BN(train stats) -> ReLU, twice.  The convs are the
    # Pallas kernel; the tiny global stats reduction + fused affine/ReLU live
    # in the wrapper (XLA fuses them with the next conv's halo gather).
    y1, m1, v1 = conv3x3_with_stats(x, w1, tile_h=tile_h)
    h1 = _bn_affine_relu(y1, g1, be1, m1, v1)
    y2, m2, v2 = conv3x3_with_stats(h1, w2, tile_h=tile_h)
    out = _bn_affine_relu(y2, g2, be2, m2, v2)[..., :out_channel]
    return jnp.transpose(out, (0, 3, 1, 2))   # back to NCHW


def ref_unet_up(x1, x2, params):
    """Pure-JAX/XLA reference mirroring the torch module (train-mode BN)."""
    w1, b1, g1, be1, w2, b2, g2, be2 = params
    _, _, h, w = x1.shape
    mh, mw = _upsample_matrix(h), _upsample_matrix(w)
    x1u = jnp.einsum('oh,bchw->bcow', mh, x1, precision=lax.Precision.HIGHEST)
    x1u = jnp.einsum('ow,bchw->bcho', mw, x1u, precision=lax.Precision.HIGHEST)
    H, W = x2.shape[2], x2.shape[3]
    diffx = W - x1u.shape[3]
    diffy = H - x1u.shape[2]
    x1u = jnp.pad(x1u, ((0, 0), (0, 0),
                        (diffx // 2, diffx - diffx // 2),
                        (diffy // 2, diffy - diffy // 2)))
    x = jnp.concatenate([x2, x1u], axis=1)

    def conv_bn_relu(h_, w_, b_, g_, be_):
        w_oihw = jnp.transpose(w_, (3, 2, 0, 1))
        y = lax.conv_general_dilated(
            h_, w_oihw, window_strides=(1, 1), padding=((1, 1), (1, 1)),
            dimension_numbers=('NCHW', 'OIHW', 'NCHW'),
            precision=lax.Precision.HIGHEST)
        y = y + b_[None, :, None, None]
        mean = jnp.mean(y, axis=(0, 2, 3), keepdims=True)
        var = jnp.mean((y - mean) ** 2, axis=(0, 2, 3), keepdims=True)
        y = (y - mean) / jnp.sqrt(var + EPS)
        return jnp.maximum(y * g_[None, :, None, None] + be_[None, :, None, None], 0.0)

    h1 = conv_bn_relu(x, w1, b1, g1, be1)
    return conv_bn_relu(h1, w2, b2, g2, be2)


if __name__ == "__main__":
    key = jax.random.PRNGKey(0)
    B = 2
    in_channel, out_channel = 16, 16
    c_skip = in_channel // 2          # channels of x2 (skip connection)
    c_low = in_channel - c_skip       # channels of x1 (coarse feature map)
    h, w = 8, 8                       # x1 spatial; x2 is 2x
    H, W = 2 * h, 2 * w

    ks = jax.random.split(key, 10)
    x1 = jax.random.normal(ks[0], (B, c_low, h, w), jnp.float32)
    x2 = jax.random.normal(ks[1], (B, c_skip, H, W), jnp.float32)
    w1 = 0.1 * jax.random.normal(ks[2], (3, 3, in_channel, out_channel), jnp.float32)
    b1 = 0.1 * jax.random.normal(ks[3], (out_channel,), jnp.float32)
    g1 = 1.0 + 0.1 * jax.random.normal(ks[4], (out_channel,), jnp.float32)
    be1 = 0.1 * jax.random.normal(ks[5], (out_channel,), jnp.float32)
    w2 = 0.1 * jax.random.normal(ks[6], (3, 3, out_channel, out_channel), jnp.float32)
    b2 = 0.1 * jax.random.normal(ks[7], (out_channel,), jnp.float32)
    g2 = 1.0 + 0.1 * jax.random.normal(ks[8], (out_channel,), jnp.float32)
    be2 = 0.1 * jax.random.normal(ks[9], (out_channel,), jnp.float32)
    params = (w1, b1, g1, be1, w2, b2, g2, be2)

    fwd = jax.jit(lambda a, b, p: unet_up(a, b, p, tile_h=8))
    y = jax.block_until_ready(fwd(x1, x2, params))
    y_ref = ref_unet_up(x1, x2, params)

    assert y.shape == (B, out_channel, H, W), y.shape
    max_err = float(jnp.max(jnp.abs(y - y_ref)))
    # tolerance covers MXU matmul-pass rounding differences vs. the XLA reference
    assert jnp.allclose(y, y_ref, atol=2e-2, rtol=2e-2), max_err
    print("KERNEL_OK")
</pallas_src>

<mosaic_0001>
module attributes {stable_mosaic.version = 11 : i64} {
  func.func @_conv3x3_stats_kernel(%arg0: i32, %arg1: memref<1x10x18x128xf32, #tpu.memory_space<vmem>>, %arg2: memref<1152x128xf32, #tpu.memory_space<vmem>>, %arg3: memref<1x8x16x128xf32, #tpu.memory_space<vmem>>, %arg4: memref<1x2x128xf32, #tpu.memory_space<vmem>>) attributes {dimension_semantics = [#tpu.dimension_semantics<parallel>], iteration_bounds = array<i64: 4>, scalar_prefetch = 0 : i64, scratch_operands = 0 : i64, tpu.core_type = #tpu.core_type<tc>, window_params = [{transform_indices = @transform_0, window_bounds = array<i64: 1, 10, 18, 128>}, {pipeline_mode = #tpu.pipeline_mode<synchronous>, transform_indices = @transform_1, window_bounds = array<i64: 1152, 128>}, {transform_indices = @transform_2, window_bounds = array<i64: 1, 8, 16, 128>}, {transform_indices = @transform_3, window_bounds = array<i64: 1, 2, 128>}]} {
    %c0 = arith.constant 0 : index
    %c0_0 = arith.constant 0 : index
    %c0_1 = arith.constant 0 : index
    %c0_2 = arith.constant 0 : index
    %0 = vector.load %arg1[%c0, %c0_0, %c0_1, %c0_2] : memref<1x10x18x128xf32, #tpu.memory_space<vmem>>, vector<1x10x18x128xf32>
    %1 = vector.shape_cast %0 : vector<1x10x18x128xf32> to vector<10x18x128xf32>
    %2 = vector.extract_strided_slice %1 {offsets = [0, 0, 0], sizes = [8, 16, 128], strides = [1, 1, 1]} : vector<10x18x128xf32> to vector<8x16x128xf32>
    %3 = vector.extract_strided_slice %1 {offsets = [0, 1, 0], sizes = [8, 16, 128], strides = [1, 1, 1]} : vector<10x18x128xf32> to vector<8x16x128xf32>
    %4 = vector.extract_strided_slice %1 {offsets = [0, 2, 0], sizes = [8, 16, 128], strides = [1, 1, 1]} : vector<10x18x128xf32> to vector<8x16x128xf32>
    %5 = vector.extract_strided_slice %1 {offsets = [1, 0, 0], sizes = [8, 16, 128], strides = [1, 1, 1]} : vector<10x18x128xf32> to vector<8x16x128xf32>
    %6 = vector.extract_strided_slice %1 {offsets = [1, 1, 0], sizes = [8, 16, 128], strides = [1, 1, 1]} : vector<10x18x128xf32> to vector<8x16x128xf32>
    %7 = vector.extract_strided_slice %1 {offsets = [1, 2, 0], sizes = [8, 16, 128], strides = [1, 1, 1]} : vector<10x18x128xf32> to vector<8x16x128xf32>
    %8 = vector.extract_strided_slice %1 {offsets = [2, 0, 0], sizes = [8, 16, 128], strides = [1, 1, 1]} : vector<10x18x128xf32> to vector<8x16x128xf32>
    %9 = vector.extract_strided_slice %1 {offsets = [2, 1, 0], sizes = [8, 16, 128], strides = [1, 1, 1]} : vector<10x18x128xf32> to vector<8x16x128xf32>
    %10 = vector.extract_strided_slice %1 {offsets = [2, 2, 0], sizes = [8, 16, 128], strides = [1, 1, 1]} : vector<10x18x128xf32> to vector<8x16x128xf32>
    %11 = tpu.concatenate %2, %3, %4, %5, %6, %7, %8, %9, %10 in 2 : vector<8x16x128xf32>, vector<8x16x128xf32>, vector<8x16x128xf32>, vector<8x16x128xf32>, vector<8x16x128xf32>, vector<8x16x128xf32>, vector<8x16x128xf32>, vector<8x16x128xf32>, vector<8x16x128xf32> -> vector<8x16x1152xf32>
    %12 = vector.shape_cast %11 : vector<8x16x1152xf32> to vector<128x1152xf32>
    %c0_3 = arith.constant 0 : index
    %c0_4 = arith.constant 0 : index
    %13 = vector.load %arg2[%c0_3, %c0_4] : memref<1152x128xf32, #tpu.memory_space<vmem>>, vector<1152x128xf32>
    %cst = arith.constant dense<0.000000e+00> : vector<128x128xf32>
    %14 = tpu.matmul %12, %13, %cst {dimension_numbers = #tpu.dot_dimension_numbers<[1], [0], [0], [1], [0, 0, 1, 1], [], []>} : vector<128x1152xf32>, vector<1152x128xf32>, vector<128x128xf32> -> vector<128x128xf32>
    %15 = vector.shape_cast %14 : vector<128x128xf32> to vector<8x16x128xf32>
    %c0_5 = arith.constant 0 : index
    %c0_6 = arith.constant 0 : index
    %c0_7 = arith.constant 0 : index
    %c0_8 = arith.constant 0 : index
    %16 = vector.load %arg3[%c0_5, %c0_6, %c0_7, %c0_8] : memref<1x8x16x128xf32, #tpu.memory_space<vmem>>, vector<1x8x16x128xf32>
    %17 = vector.shape_cast %16 : vector<1x8x16x128xf32> to vector<8x16x128xf32>
    %18 = vector.shape_cast %15 : vector<8x16x128xf32> to vector<1x8x16x128xf32>
    tpu.vector_store %arg3[%c0_5, %c0_6, %c0_7, %c0_8], %18 {strides = array<i32>} : memref<1x8x16x128xf32, #tpu.memory_space<vmem>>, vector<1x8x16x128xf32>,
    %cst_9 = arith.constant dense<0.000000e+00> : vector<128xf32>
    %19 = vector.multi_reduction <add>, %14, %cst_9 [0] : vector<128x128xf32> to vector<128xf32>
    %20 = vector.shape_cast %19 : vector<128xf32> to vector<1x128xf32>
    %21 = arith.mulf %14, %14 : vector<128x128xf32>
    %cst_10 = arith.constant dense<0.000000e+00> : vector<128xf32>
    %22 = vector.multi_reduction <add>, %21, %cst_10 [0] : vector<128x128xf32> to vector<128xf32>
    %23 = vector.shape_cast %22 : vector<128xf32> to vector<1x128xf32>
    %24 = tpu.concatenate %20, %23 in 0 : vector<1x128xf32>, vector<1x128xf32> -> vector<2x128xf32>
    %c0_11 = arith.constant 0 : index
    %c0_12 = arith.constant 0 : index
    %c0_13 = arith.constant 0 : index
    %25 = vector.load %arg4[%c0_11, %c0_12, %c0_13] : memref<1x2x128xf32, #tpu.memory_space<vmem>>, vector<1x2x128xf32>
    %26 = vector.shape_cast %25 : vector<1x2x128xf32> to vector<2x128xf32>
    %27 = vector.shape_cast %24 : vector<2x128xf32> to vector<1x2x128xf32>
    tpu.vector_store %arg4[%c0_11, %c0_12, %c0_13], %27 {strides = array<i32>} : memref<1x2x128xf32, #tpu.memory_space<vmem>>, vector<1x2x128xf32>,
    return
  }
  func.func @transform_0(%arg0: i32) -> (i32, i32, i32, i32) {
    %c0_i32 = arith.constant 0 : i32
    %c0_i32_0 = arith.constant 0 : i32
    %c0_i32_1 = arith.constant 0 : i32
    %c0_i32_2 = arith.constant 0 : i32
    return %arg0, %c0_i32, %c0_i32_0, %c0_i32_1 : i32, i32, i32, i32
  }
  func.func @transform_1(%arg0: i32) -> (i32, i32) {
    %c0_i32 = arith.constant 0 : i32
    %c0_i32_0 = arith.constant 0 : i32
    %c0_i32_1 = arith.constant 0 : i32
    return %c0_i32, %c0_i32_0 : i32, i32
  }
  func.func @transform_2(%arg0: i32) -> (i32, i32, i32, i32) {
    %c0_i32 = arith.constant 0 : i32
    %c0_i32_0 = arith.constant 0 : i32
    %c0_i32_1 = arith.constant 0 : i32
    %c0_i32_2 = arith.constant 0 : i32
    return %arg0, %c0_i32, %c0_i32_0, %c0_i32_1 : i32, i32, i32, i32
  }
  func.func @transform_3(%arg0: i32) -> (i32, i32, i32) {
    %c0_i32 = arith.constant 0 : i32
    %c0_i32_0 = arith.constant 0 : i32
    %c0_i32_1 = arith.constant 0 : i32
    return %arg0, %c0_i32, %c0_i32_0 : i32, i32, i32
  }
}

</mosaic_0001>

<bundles_post_ra>
// kernel: _lambda_.2
= control target key start
LH: loop header
LB: loop body
LE: loop exit
PB: predicated region body
PF: predicated region fallthrough
CT: control target
= control target key end

     0   :  { %s1376_s12 = smov 0   ;;  %s2293_s0 = inlined_call_operand.vmem [shape: f32[4,10,18,128], index: 0, kind: input, shape index: {}]   ;;  %s2294_s1 = inlined_call_operand.vmem [shape: f32[1152,128], index: 1, kind: input, shape index: {}]   ;;  %s2295_s2 = inlined_call_operand.vmem [shape: f32[4,8,16,128], index: 2, kind: output, shape index: {0}]   ;;  %s2296_s3 = inlined_call_operand.vmem [shape: f32[4,2,128], index: 3, kind: output, shape index: {1}]  }
   0x1 LB: > { %s1276_s13 = sadd.s32 4294967295, %s1354_s12   ;;  %p1280_p0 = scmp.ge.s32.totalorder %s1354_s12, 1  ;;  %s1354_s12 = sphi %s1376_s12, %s14_s12  }
   0x2   : > { %p140_p1 = scmp.lt.s32.totalorder %s1354_s12, 5 }
   0x4   : > { %p141_p2 = pnand %p1280_p0, %p140_p1 }
   0x6   : > { %144 = sbr.rel (%p141_p2) target bundleno = 485 (0x1e5), region = 28 }
   0xb   : > { %v399_v0 = vld [vmem:[%s2294_s1 + $0x78] sm:$0xff]  ;;  %v398_v1 = vld [vmem:[%s2294_s1 + $0x70] sm:$0xff]  ;;  %v397_v2 = vld [vmem:[%s2294_s1 + $0x68] sm:$0xff]  ;;  %p168_p3 = scmp.lt.s32.totalorder %s1276_s13, 3  ;;  %vm293_vm0 = vcmask 1045504   ;;  %vm236_vm1 = vcmask 1046528  }
   0xc   : > { %1288 = vmatpush.msra.mxu1 %v399_v0  ;;  %1289 = vmatpush.msra.mxu2 %v399_v0  ;;  %v396_v3 = vld [vmem:[%s2294_s1 + $0x60] sm:$0xff]  ;;  %v395_v4 = vld [vmem:[%s2294_s1 + $0x58] sm:$0xff]  ;;  %v394_v5 = vld [vmem:[%s2294_s1 + $0x50] sm:$0xff]  ;;  %vm1187_vm2 = vcmask 1040384  }
   0xd   : > { %1290 = vmatpush.msra.mxu3 %v399_v0  ;;  %528 = vmatpush.msra.mxu0 %v399_v0  ;;  %v393_v6 = vld [vmem:[%s2294_s1 + $0x48] sm:$0xff]  ;;  %v392_v7 = vld [vmem:[%s2294_s1 + $0x40] sm:$0xff]  ;;  %v391_v8 = vld [vmem:[%s2294_s1 + $0x38] sm:$0xff]  ;;  %s2302_s13 = smov (!%p168_p3, %s1276_s13), 3 }
   0xe   : > { %1291 = vmatpush.msra.mxu1 %v398_v1  ;;  %1292 = vmatpush.msra.mxu2 %v398_v1  ;;  %v390_v9 = vld [vmem:[%s2294_s1 + $0x30] sm:$0xff]  ;;  %v389_v10 = vld [vmem:[%s2294_s1 + $0x28] sm:$0xff]  ;;  %v388_v11 = vld [vmem:[%s2294_s1 + $0x20] sm:$0xff]  ;;  %s1336_s15 = smul.u32 240, %s2302_s13  ;;  %s1284_s19 = sshll.u32 %s2302_s13, 1 }
   0xf   : > { %1293 = vmatpush.msra.mxu3 %v398_v1  ;;  %529 = vmatpush.msra.mxu0 %v398_v1  ;;  %v387_v12 = vld [vmem:[%s2294_s1 + $0x18] sm:$0xff]  ;;  %v386_v13 = vld [vmem:[%s2294_s1 + $0x10] sm:$0xff]  ;;  %v385_v14 = vld [vmem:[%s2294_s1 + $0x8] sm:$0xff]  ;;  %s181_s23 = scalar_lea.vmem %s2296_s3, %s1284_s19 }
  0x10   : > { %1294 = vmatpush.msra.mxu1 %v397_v2  ;;  %1295 = vmatpush.msra.mxu2 %v397_v2  ;;  %s1439_s22 = scalar_lea.vmem %s2293_s0, %s1336_s15  ;;  %v384_v15 = vld [vmem:[%s2294_s1] sm:$0xff]  ;;  %v431_v18 = vld [vmem:[%s2294_s1 + $0x178] sm:$0xff]  ;;  %v430_v21 = vld [vmem:[%s2294_s1 + $0x170] sm:$0xff] }
  0x11   : > { %1296 = vmatpush.msra.mxu3 %v397_v2  ;;  %530 = vmatpush.msra.mxu0 %v397_v2  ;;  %v1445_v16 = vld [vmem:[%s1439_s22 + $0x30] sm:$0xff]  ;;  %v1448_v17 = vld [vmem:[%s1439_s22 + $0x60] sm:$0xff]  ;;  %v415_v19 = vld [vmem:[%s2294_s1 + $0xf8] sm:$0xff] }
  0x12   : > { %1297 = vmatpush.msra.mxu1 %v396_v3  ;;  %1298 = vmatpush.msra.mxu2 %v396_v3  ;;  %v1457_v20 = vld [vmem:[%s1439_s22 + $0x90] sm:$0xff]  ;;  %v447_v22 = vld [vmem:[%s2294_s1 + $0x1f8] sm:$0xff]  ;;  %v429_v24 = vld [vmem:[%s2294_s1 + $0x168] sm:$0xff] }
  0x13   : > { %1299 = vmatpush.msra.mxu3 %v396_v3  ;;  %531 = vmatpush.msra.mxu0 %v396_v3  ;;  %v414_v23 = vld [vmem:[%s2294_s1 + $0xf0] sm:$0xff]  ;;  %v413_v26 = vld [vmem:[%s2294_s1 + $0xe8] sm:$0xff]  ;;  %v1481_v27 = vld [vmem:[%s1439_s22] sm:$0xff] }
  0x14   : > { %1300 = vmatpush.msra.mxu1 %v395_v4  ;;  %1301 = vmatpush.msra.mxu2 %v395_v4  ;;  %v446_v25 = vld [vmem:[%s2294_s1 + $0x1f0] sm:$0xff]  ;;  %v428_v28 = vld [vmem:[%s2294_s1 + $0x160] sm:$0xff]  ;;  %v445_v29 = vld [vmem:[%s2294_s1 + $0x1e8] sm:$0xff] }
  0x15   : > { %1302 = vmatpush.msra.mxu3 %v395_v4  ;;  %532 = vmatpush.msra.mxu0 %v395_v4  ;;  %v412_v30 = vld [vmem:[%s2294_s1 + $0xe0] sm:$0xff]  ;;  %v1493_v31 = vld [vmem:[%s1439_s22 + $0x68] sm:$0xff]  ;;  %v1496_v32 = vld [vmem:[%s1439_s22 + $0x38] sm:$0xff] }
  0x16   : > { %1303 = vmatpush.msra.mxu1 %v394_v5  ;;  %1304 = vmatpush.msra.mxu2 %v394_v5  ;;  %v427_v33 = vld [vmem:[%s2294_s1 + $0x158] sm:$0xff]  ;;  %v444_v34 = vld [vmem:[%s2294_s1 + $0x1e0] sm:$0xff]  ;;  %v426_v37 = vld [vmem:[%s2294_s1 + $0x150] sm:$0xff] }
  0x17   : > { %1305 = vmatpush.msra.mxu3 %v394_v5  ;;  %533 = vmatpush.msra.mxu0 %v394_v5  ;;  %v411_v35 = vld [vmem:[%s2294_s1 + $0xd8] sm:$0xff]  ;;  %v410_v40 = vld [vmem:[%s2294_s1 + $0xd0] sm:$0xff]  ;;  %v425_v41 = vld [vmem:[%s2294_s1 + $0x148] sm:$0xff] }
  0x18   : > { %1306 = vmatpush.msra.mxu1 %v393_v6  ;;  %1307 = vmatpush.msra.mxu2 %v393_v6  ;;  %v1510_v36 = vld [vmem:[%s1439_s22 + $0x98] sm:$0xff]  ;;  %v442_v42 = vld [vmem:[%s2294_s1 + $0x1d0] sm:$0xff]  ;;  %v409_v44 = vld [vmem:[%s2294_s1 + $0xc8] sm:$0xff] }
  0x19   : > { %1308 = vmatpush.msra.mxu3 %v393_v6  ;;  %534 = vmatpush.msra.mxu0 %v393_v6  ;;  %v443_v38 = vld [vmem:[%s2294_s1 + $0x1d8] sm:$0xff]  ;;  %v462_v43 = vld [vmem:[%s2294_s1 + $0x270] sm:$0xff]  ;;  %v424_v45 = vld [vmem:[%s2294_s1 + $0x140] sm:$0xff] }
  0x1a   : > { %1309 = vmatpush.msra.mxu1 %v392_v7  ;;  %1310 = vmatpush.msra.mxu2 %v392_v7  ;;  %v463_v39 = vld [vmem:[%s2294_s1 + $0x278] sm:$0xff]  ;;  %v441_v46 = vld [vmem:[%s2294_s1 + $0x1c8] sm:$0xff]  ;;  %v408_v48 = vld [vmem:[%s2294_s1 + $0xc0] sm:$0xff] }
  0x1b   : > { %1311 = vmatpush.msra.mxu3 %v392_v7  ;;  %535 = vmatpush.msra.mxu0 %v392_v7  ;;  %v461_v47 = vld [vmem:[%s2294_s1 + $0x268] sm:$0xff]  ;;  %v1551_v49 = vld [vmem:[%s1439_s22 + $0x78] sm:$0xff]  ;;  %v440_v52 = vld [vmem:[%s2294_s1 + $0x1c0] sm:$0xff] }
  0x1c   : > { %1312 = vmatpush.msra.mxu1 %v391_v8  ;;  %1313 = vmatpush.msra.mxu2 %v391_v8  ;;  %v1554_v50 = vld [vmem:[%s1439_s22 + $0x48] sm:$0xff]  ;;  %v423_v51 = vld [vmem:[%s2294_s1 + $0x138] sm:$0xff]  ;;  %v460_v53 = vld [vmem:[%s2294_s1 + $0x260] sm:$0xff] }
  0x1d   : > { %1314 = vmatpush.msra.mxu3 %v391_v8  ;;  %536 = vmatpush.msra.mxu0 %v391_v8  ;;  %v407_v54 = vld [vmem:[%s2294_s1 + $0xb8] sm:$0xff]  ;;  %v1570_v55 = vld [vmem:[%s1439_s22 + $0x8] sm:$0xff]  ;;  %v422_v57 = vld [vmem:[%s2294_s1 + $0x130] sm:$0xff] }
  0x1e   : > { %1315 = vmatpush.msra.mxu1 %v390_v9  ;;  %1316 = vmatpush.msra.mxu2 %v390_v9  ;;  %v1574_v56 = vld [vmem:[%s1439_s22 + $0xa8] sm:$0xff]  ;;  %v439_v58 = vld [vmem:[%s2294_s1 + $0x1b8] sm:$0xff]  ;;  %v406_v60 = vld [vmem:[%s2294_s1 + $0xb0] sm:$0xff] }
  0x1f   : > { %1317 = vmatpush.msra.mxu3 %v390_v9  ;;  %537 = vmatpush.msra.mxu0 %v390_v9  ;;  %v459_v59 = vld [vmem:[%s2294_s1 + $0x258] sm:$0xff]  ;;  %v421_v61 = vld [vmem:[%s2294_s1 + $0x128] sm:$0xff]  ;;  %v438_v62 = vld [vmem:[%s2294_s1 + $0x1b0] sm:$0xff] }
  0x20   : > { %1318 = vmatpush.msra.mxu1 %v389_v10  ;;  %1319 = vmatpush.msra.mxu2 %v389_v10  ;;  %v458_v63 = vld [vmem:[%s2294_s1 + $0x250] sm:$0xff]  ;;  %v405_v0 = vld [vmem:[%s2294_s1 + $0xa8] sm:$0xff]  ;;  %v420_v1 = vld [vmem:[%s2294_s1 + $0x120] sm:$0xff] }
  0x21   : > { %1320 = vmatpush.msra.mxu3 %v389_v10  ;;  %538 = vmatpush.msra.mxu0 %v389_v10  ;;  %v437_v2 = vld [vmem:[%s2294_s1 + $0x1a8] sm:$0xff]  ;;  %v404_v4 = vld [vmem:[%s2294_s1 + $0xa0] sm:$0xff]  ;;  %v1618_v6 = vld [vmem:[%s1439_s22 + $0x50] sm:$0xff] }
  0x22   : > { %1321 = vmatpush.msra.mxu1 %v388_v11  ;;  %1322 = vmatpush.msra.mxu2 %v388_v11  ;;  %v457_v3 = vld [vmem:[%s2294_s1 + $0x248] sm:$0xff]  ;;  %v1615_v5 = vld [vmem:[%s1439_s22 + $0x80] sm:$0xff]  ;;  %v419_v7 = vld [vmem:[%s2294_s1 + $0x118] sm:$0xff] }
  0x23   : > { %1323 = vmatpush.msra.mxu3 %v388_v11  ;;  %539 = vmatpush.msra.mxu0 %v388_v11  ;;  %v436_v8 = vld [vmem:[%s2294_s1 + $0x1a0] sm:$0xff]  ;;  %v403_v10 = vld [vmem:[%s2294_s1 + $0x98] sm:$0xff] }
  0x24   : > { %1324 = vmatpush.msra.mxu1 %v387_v12  ;;  %1325 = vmatpush.msra.mxu2 %v387_v12  ;;  %v456_v9 = vld [vmem:[%s2294_s1 + $0x240] sm:$0xff]  ;;  %v1634_v11 = vld [vmem:[%s1439_s22 + $0x18] sm:$0xff] }
  0x25   : > { %1326 = vmatpush.msra.mxu3 %v387_v12  ;;  %540 = vmatpush.msra.mxu0 %v387_v12  ;;  %v1638_v12 = vld [vmem:[%s1439_s22 + $0xb0] sm:$0xff] }
  0x26   : > { %1327 = vmatpush.msra.mxu1 %v386_v13  ;;  %1328 = vmatpush.msra.mxu2 %v386_v13 }
  0x27   : > { %1329 = vmatpush.msra.mxu3 %v386_v13  ;;  %541 = vmatpush.msra.mxu0 %v386_v13  ;;  %v418_v13 = vld [vmem:[%s2294_s1 + $0x110] sm:$0xff] }
  0x28   : > { %1330 = vmatpush.msra.mxu1 %v385_v14  ;;  %1331 = vmatpush.msra.mxu2 %v385_v14 }
  0x29   : > { %1332 = vmatpush.msra.mxu3 %v385_v14  ;;  %542 = vmatpush.msra.mxu0 %v385_v14  ;;  %v435_v14 = vld [vmem:[%s2294_s1 + $0x198] sm:$0xff] }
  0x2a   : > { %1333 = vmatpush.msra.mxu1 %v384_v15  ;;  %1334 = vmatpush.msra.mxu2 %v384_v15 }
  0x2b   : > { %556 = vmatmul.f32.vlgmr.msra.gmra.mxu1 %v1445_v16  ;;  %568 = vmatmul.f32.vlgmr.msra.gmra.mxu2 %v1448_v17 }
  0x2c   : > { %658 = vmatpush.msrb.mxu2 %v431_v18  ;;  %1335 = vmatpush.msra.mxu3 %v384_v15  ;;  %v294_v18 = vrot.slane %v1481_v27, 2 }
  0x2d   : > { %593 = vmatpush.msrb.mxu1 %v415_v19  ;;  %580 = vmatmul.f32.vlgmr.msra.gmra.mxu3 %v1457_v20  ;;  %v295_v19 = vrot.slane %v1570_v55, 2 }
  0x2e   : > { %659 = vmatpush.msrb.mxu2 %v430_v21  ;;  %723 = vmatpush.msrb.mxu3 %v447_v22  ;;  %v402_v21 = vld [vmem:[%s2294_s1 + $0x90] sm:$0xff]  ;;  %v417_v22 = vld [vmem:[%s2294_s1 + $0x108] sm:$0xff] }
  0x2f   : > { %594 = vmatpush.msrb.mxu1 %v414_v23  ;;  %543 = vmatpush.msra.mxu0 %v384_v15  ;;  %v455_v15 = vld [vmem:[%s2294_s1 + $0x238] sm:$0xff]  ;;  %v237_v23 = vrot.slane %v1481_v27, 1 }
  0x30   : > { %660 = vmatpush.msrb.mxu2 %v429_v24  ;;  %724 = vmatpush.msrb.mxu3 %v446_v25  ;;  %v238_v24 = vrot.slane %v1570_v55, 1  ;;  %v434_v25 = vld [vmem:[%s2294_s1 + $0x190] sm:$0xff] }
  0x31   : > { %595 = vmatpush.msrb.mxu1 %v413_v26  ;;  %544 = vmatmul.f32.vlgmr.msra.gmra.mxu0 %v1481_v27  ;;  %v454_v26 = vld [vmem:[%s2294_s1 + $0x230] sm:$0xff]  ;;  %v401_v27 = vld [vmem:[%s2294_s1 + $0x88] sm:$0xff] }
  0x32   : > { %661 = vmatpush.msrb.mxu2 %v428_v28  ;;  %725 = vmatpush.msrb.mxu3 %v445_v29  ;;  %v416_v28 = vld [vmem:[%s2294_s1 + $0x100] sm:$0xff]  ;;  %v433_v29 = vld [vmem:[%s2294_s1 + $0x188] sm:$0xff] }
  0x33   : > { %596 = vmatpush.msrb.mxu1 %v412_v30  ;;  %571 = vmatmul.f32.gmra.mxu2 %v1493_v31  ;;  %v453_v30 = vld [vmem:[%s2294_s1 + $0x228] sm:$0xff] }
  0x34   : > { %559 = vmatmul.f32.gmra.mxu1 %v1496_v32  ;;  %662 = vmatpush.msrb.mxu2 %v427_v33  ;;  %v400_v33 = vld [vmem:[%s2294_s1 + $0x80] sm:$0xff] }
  0x35   : > { %726 = vmatpush.msrb.mxu3 %v444_v34  ;;  %597 = vmatpush.msrb.mxu1 %v411_v35  ;;  %v296_v34 = vsel %vm293_vm0, %v294_v18, %v295_v19  ;;  %v239_v35 = vsel %vm236_vm1, %v237_v23, %v238_v24  ;;  %v525_v18 = vld [vmem:[%s2294_s1 + $0x468] sm:$0xff] }
  0x36   : > { %583 = vmatmul.f32.gmra.mxu3 %v1510_v36  ;;  %663 = vmatpush.msrb.mxu2 %v426_v37  ;;  %v432_v37 = vld [vmem:[%s2294_s1 + $0x180] sm:$0xff] }
  0x37   : > { %727 = vmatpush.msrb.mxu3 %v443_v38  ;;  %788 = vmatpush.msrb.mxu0 %v463_v39  ;;  %v184_v38 = vld [vmem:[%s1439_s22 + $0x10] sm:$0x3]  ;;  %v452_v39 = vld [vmem:[%s2294_s1 + $0x220] sm:$0xff] }
  0x38   : > { %598 = vmatpush.msrb.mxu1 %v410_v40  ;;  %664 = vmatpush.msrb.mxu2 %v425_v41  ;;  %v495_v40 = vld [vmem:[%s2294_s1 + $0x378] sm:$0xff]  ;;  %v1695_v41 = vld [vmem:[%s1439_s22 + $0x20] sm:$0xff] }
  0x39   : > { %728 = vmatpush.msrb.mxu3 %v442_v42  ;;  %789 = vmatpush.msrb.mxu0 %v462_v43  ;;  %v451_v42 = vld [vmem:[%s2294_s1 + $0x218] sm:$0xff] }
  0x3a   : > { %599 = vmatpush.msrb.mxu1 %v409_v44  ;;  %665 = vmatpush.msrb.mxu2 %v424_v45  ;;  %v511_v43 = vld [vmem:[%s2294_s1 + $0x3f8] sm:$0xff]  ;;  %v297_v44 = vrot.slane %v184_v38, 2 }
  0x3b   : > { %729 = vmatpush.msrb.mxu3 %v441_v46  ;;  %790 = vmatpush.msrb.mxu0 %v461_v47  ;;  %v479_v45 = vld [vmem:[%s2294_s1 + $0x2f8] sm:$0xff]  ;;  %v240_v46 = vrot.slane %v184_v38, 1  ;;  %v494_v47 = vld [vmem:[%s2294_s1 + $0x370] sm:$0xff]  ;;  %v304_v38 = vrot.slane %v1445_v16, 2 }
  0x3c   : > { %600 = vmatpush.msrb.mxu1 %v408_v48  ;;  %574 = vmatmul.f32.gmra.mxu2 %v1551_v49  ;;  %v450_v48 = vld [vmem:[%s2294_s1 + $0x210] sm:$0xff] }
  0x3d   : > { %562 = vmatmul.f32.gmra.mxu1 %v1554_v50  ;;  %666 = vmatpush.msrb.mxu2 %v423_v51  ;;  %v510_v51 = vld [vmem:[%s2294_s1 + $0x3f0] sm:$0xff] }
  0x3e   : > { %730 = vmatpush.msrb.mxu3 %v440_v52  ;;  %791 = vmatpush.msrb.mxu0 %v460_v53  ;;  %v242_v52 = vrot.slane %v1634_v11, 1  ;;  %v243_v53 = vrot.slane %v1695_v41, 1 }
  0x3f   : > { %601 = vmatpush.msrb.mxu1 %v407_v54  ;;  %547 = vmatmul.f32.gmra.mxu0 %v1570_v55  ;;  %v478_v54 = vld [vmem:[%s2294_s1 + $0x2f0] sm:$0xff]  ;;  %v493_v55 = vld [vmem:[%s2294_s1 + $0x368] sm:$0xff] }
  0x40   : > { %586 = vmatmul.f32.gmra.mxu3 %v1574_v56  ;;  %667 = vmatpush.msrb.mxu2 %v422_v57  ;;  %v449_v57 = vld [vmem:[%s2294_s1 + $0x208] sm:$0xff] }
  0x41   : > { %731 = vmatpush.msrb.mxu3 %v439_v58  ;;  %792 = vmatpush.msrb.mxu0 %v459_v59  ;;  %v298_v58 = vsel %vm293_vm0, %v295_v19, %v297_v44  ;;  %v241_v59 = vsel %vm236_vm1, %v238_v24, %v240_v46  ;;  %v490_v19 = vld [vmem:[%s2294_s1 + $0x350] sm:$0xff]  ;;  %v472_v44 = vld [vmem:[%s2294_s1 + $0x2c0] sm:$0xff] }
  0x42   : > { %602 = vmatpush.msrb.mxu1 %v406_v60  ;;  %668 = vmatpush.msrb.mxu2 %v421_v61  ;;  %v509_v60 = vld [vmem:[%s2294_s1 + $0x3e8] sm:$0xff]  ;;  %v448_v61 = vld [vmem:[%s2294_s1 + $0x200] sm:$0xff] }
  0x43   : > { %732 = vmatpush.msrb.mxu3 %v438_v62  ;;  %793 = vmatpush.msrb.mxu0 %v458_v63  ;;  %v477_v62 = vld [vmem:[%s2294_s1 + $0x2e8] sm:$0xff]  ;;  %v244_v63 = vsel %vm236_vm1, %v242_v52, %v243_v53  ;;  %v503_v52 = vld [vmem:[%s2294_s1 + $0x3b8] sm:$0xff] }
  0x44   : > { %603 = vmatpush.msrb.mxu1 %v405_v0  ;;  %669 = vmatpush.msrb.mxu2 %v420_v1  ;;  %v527_v0 = vld [vmem:[%s2294_s1 + $0x478] sm:$0xff]  ;;  %v299_v1 = vrot.slane %v1634_v11, 2 }
  0x45   : > { %733 = vmatpush.msrb.mxu3 %v437_v2  ;;  %794 = vmatpush.msrb.mxu0 %v457_v3  ;;  %v300_v2 = vrot.slane %v1695_v41, 2  ;;  %v187_v3 = vld [vmem:[%s1439_s22 + $0x28] sm:$0x3] }
  0x46   : > { %604 = vmatpush.msrb.mxu1 %v404_v4  ;;  %577 = vmatmul.f32.gmra.mxu2 %v1615_v5  ;;  %v492_v4 = vld [vmem:[%s2294_s1 + $0x360] sm:$0xff]  ;;  %v302_v24 = vrot.slane %v187_v3, 2 }
  0x47   : > { %565 = vmatmul.f32.gmra.mxu1 %v1618_v6  ;;  %670 = vmatpush.msrb.mxu2 %v419_v7  ;;  %v508_v7 = vld [vmem:[%s2294_s1 + $0x3e0] sm:$0xff] }
  0x48   : > { %734 = vmatpush.msrb.mxu3 %v436_v8  ;;  %795 = vmatpush.msrb.mxu0 %v456_v9  ;;  %v476_v8 = vld [vmem:[%s2294_s1 + $0x2e0] sm:$0xff]  ;;  %v526_v9 = vld [vmem:[%s2294_s1 + $0x470] sm:$0xff] }
  0x49   : > { %605 = vmatpush.msrb.mxu1 %v403_v10  ;;  %550 = vmatmul.f32.gmra.mxu0 %v1634_v11  ;;  %v491_v10 = vld [vmem:[%s2294_s1 + $0x358] sm:$0xff] }
  0x4a   : > { %589 = vmatmul.f32.gmra.mxu3 %v1638_v12  ;;  %671 = vmatpush.msrb.mxu2 %v418_v13  ;;  %v507_v13 = vld [vmem:[%s2294_s1 + $0x3d8] sm:$0xff] }
  0x4b   : > { %735 = vmatpush.msrb.mxu3 %v435_v14  ;;  %796 = vmatpush.msrb.mxu0 %v455_v15  ;;  %v475_v14 = vld [vmem:[%s2294_s1 + $0x2d8] sm:$0xff]  ;;  %v1769_v15 = vsel %vm293_vm0, %v299_v1, %v300_v2 }
  0x4c   : > { %606 = vmatpush.msrb.mxu1 %v402_v21  ;;  %672 = vmatpush.msrb.mxu2 %v417_v22  ;;  %v524_v21 = vld [vmem:[%s2294_s1 + $0x460] sm:$0xff]  ;;  %v506_v22 = vld [vmem:[%s2294_s1 + $0x3d0] sm:$0xff]  ;;  %v519_v1 = vld [vmem:[%s2294_s1 + $0x438] sm:$0xff] }
  0x4d   : > { %736 = vmatpush.msrb.mxu3 %v434_v25  ;;  %797 = vmatpush.msrb.mxu0 %v454_v26  ;;  %v523_v25 = vld [vmem:[%s2294_s1 + $0x458] sm:$0xff]  ;;  %v474_v26 = vld [vmem:[%s2294_s1 + $0x2d0] sm:$0xff] }
  0x4e   : > { %607 = vmatpush.msrb.mxu1 %v401_v27  ;;  %673 = vmatpush.msrb.mxu2 %v416_v28  ;;  %v489_v27 = vld [vmem:[%s2294_s1 + $0x348] sm:$0xff] }
  0x4f   : > { %737 = vmatpush.msrb.mxu3 %v433_v29  ;;  %798 = vmatpush.msrb.mxu0 %v453_v30  ;;  %v505_v28 = vld [vmem:[%s2294_s1 + $0x3c8] sm:$0xff]  ;;  %v522_v29 = vld [vmem:[%s2294_s1 + $0x450] sm:$0xff] }
  0x50   : > { %608 = vmatpush.msrb.mxu1 %v400_v33  ;;  %674 = vmatmul.f32.vlgmr.msrb.gmra.mxu2 %v296_v34  ;;  %v473_v30 = vld [vmem:[%s2294_s1 + $0x2c8] sm:$0xff]  ;;  %v247_v33 = vrot.slane %v1445_v16, 1  ;;  %v248_v34 = vrot.slane %v1496_v32, 1 }
  0x51   : > { %609 = vmatmul.f32.vlgmr.msrb.gmra.mxu1 %v239_v35  ;;  %738 = vmatpush.msrb.mxu3 %v432_v37  ;;  %v1807_v35 = vsel %vm293_vm0, %v300_v2, %v302_v24  ;;  %v470_v2 = vld [vmem:[%s2294_s1 + $0x2b0] sm:$0xff] }
  0x52   : > { %799 = vmatpush.msrb.mxu0 %v452_v39  ;;  %918 = vmatpush.msra.mxu2 %v495_v40  ;;  %v1811_v37 = vsel %vm236_vm1, %v247_v33, %v248_v34  ;;  %v305_v39 = vrot.slane %v1496_v32, 2  ;;  %v190_v40 = vld [vmem:[%s1439_s22 + $0x40] sm:$0x3]  ;;  %v196_v24 = vld [vmem:[%s1439_s22 + $0x70] sm:$0x3] }
  0x53   : > { %553 = vmatmul.f32.gmra.mxu0 %v1695_v41  ;;  %739 = vmatmul.f32.vlgmr.msrb.gmra.mxu3 %v1634_v11  ;;  %v245_v11 = vrot.slane %v187_v3, 1  ;;  %v317_v33 = vrot.slane %v196_v24, 2 }
  0x54   : > { %800 = vmatpush.msrb.mxu0 %v451_v42  ;;  %983 = vmatpush.msra.mxu3 %v511_v43  ;;  %v504_v42 = vld [vmem:[%s2294_s1 + $0x3c0] sm:$0xff]  ;;  %v521_v43 = vld [vmem:[%s2294_s1 + $0x448] sm:$0xff]  ;;  %v1831_v46 = vsel %vm293_vm0, %v304_v38, %v305_v39  ;;  %v499_v38 = vld [vmem:[%s2294_s1 + $0x398] sm:$0xff] }
  0x55   : > { %853 = vmatpush.msra.mxu1 %v479_v45  ;;  %919 = vmatpush.msra.mxu2 %v494_v47  ;;  %v246_v23 = vsel %vm236_vm1, %v243_v53, %v245_v11  ;;  %v250_v45 = vrot.slane %v190_v40, 1  ;;  %v520_v53 = vld [vmem:[%s2294_s1 + $0x440] sm:$0xff]  ;;  %v518_v11 = vld [vmem:[%s2294_s1 + $0x430] sm:$0xff] }
  0x56   : > { %801 = vmatpush.msrb.mxu0 %v450_v48  ;;  %984 = vmatpush.msra.mxu3 %v510_v51  ;;  %v307_v48 = vrot.slane %v190_v40, 2  ;;  %v487_v51 = vld [vmem:[%s2294_s1 + $0x338] sm:$0xff] }
  0x57   : > { %854 = vmatpush.msra.mxu1 %v478_v54  ;;  %920 = vmatpush.msra.mxu2 %v493_v55  ;;  %v1835_v47 = vsel %vm236_vm1, %v248_v34, %v250_v45  ;;  %v471_v54 = vld [vmem:[%s2294_s1 + $0x2b8] sm:$0xff]  ;;  %v252_v55 = vrot.slane %v1554_v50, 1  ;;  %v319_v45 = vrot.slane %v1551_v49, 2 }
  0x58   : > { %802 = vmatpush.msrb.mxu0 %v449_v57  ;;  %677 = vmatmul.f32.gmra.mxu2 %v298_v58  ;;  %v253_v57 = vrot.slane %v1618_v6, 1  ;;  %v1855_v58 = vsel %vm293_vm0, %v305_v39, %v307_v48  ;;  %v483_v34 = vld [vmem:[%s2294_s1 + $0x318] sm:$0xff]  ;;  %v516_v39 = vld [vmem:[%s2294_s1 + $0x420] sm:$0xff]  ;;  %v320_v48 = vrot.slane %v1615_v5, 2 }
  0x59   : > { %612 = vmatmul.f32.gmra.mxu1 %v241_v59  ;;  %985 = vmatpush.msra.mxu3 %v509_v60  ;;  %v309_v60 = vrot.slane %v1554_v50, 2  ;;  %v467_v40 = vld [vmem:[%s2294_s1 + $0x298] sm:$0xff] }
  0x5a   : > { %803 = vmatpush.msrb.mxu0 %v448_v61  ;;  %855 = vmatpush.msra.mxu1 %v477_v62  ;;  %v1859_v59 = vsel %vm236_vm1, %v252_v55, %v253_v57  ;;  %v310_v61 = vrot.slane %v1618_v6, 2  ;;  %v193_v62 = vld [vmem:[%s1439_s22 + $0x58] sm:$0x3]  ;;  %v466_v55 = vld [vmem:[%s2294_s1 + $0x290] sm:$0xff] }
  0x5b   : > { %742 = vmatmul.f32.gmra.mxu3 %v1695_v41  ;;  %804 = vmatmul.f32.vlgmr.msrb.gmra.mxu0 %v244_v63  ;;  %v488_v41 = vld [vmem:[%s2294_s1 + $0x340] sm:$0xff]  ;;  %v255_v3 = vrot.slane %v193_v62, 1 }
  0x5c   : > { %1048 = vmatpush.msra.mxu0 %v527_v0  ;;  %921 = vmatpush.msra.mxu2 %v492_v4  ;;  %v502_v0 = vld [vmem:[%s2294_s1 + $0x3b0] sm:$0xff]  ;;  %v1880_v4 = vsel %vm293_vm0, %v309_v60, %v310_v61  ;;  %v1978_v60 = vsel %vm293_vm0, %v319_v45, %v320_v48 }
  0x5d   : > { %986 = vmatpush.msra.mxu3 %v508_v7  ;;  %856 = vmatpush.msra.mxu1 %v476_v8  ;;  %v1884_v7 = vsel %vm236_vm1, %v253_v57, %v255_v3  ;;  %v312_v8 = vrot.slane %v193_v62, 2  ;;  %v267_v3 = vrot.slane %v1457_v20, 1 }
  0x5e   : > { %1049 = vmatpush.msra.mxu0 %v526_v9  ;;  %922 = vmatpush.msra.mxu2 %v491_v10  ;;  %v485_v9 = vld [vmem:[%s2294_s1 + $0x328] sm:$0xff] }
  0x5f   : > { %987 = vmatpush.msra.mxu3 %v507_v13  ;;  %857 = vmatpush.msra.mxu1 %v475_v14  ;;  %v501_v10 = vld [vmem:[%s2294_s1 + $0x3a8] sm:$0xff]  ;;  %v257_v14 = vrot.slane %v1448_v17, 1 }
  0x60   : > { %680 = vmatmul.f32.gmra.mxu2 %v1769_v15  ;;  %1050 = vmatpush.msra.mxu0 %v525_v18  ;;  %v469_v13 = vld [vmem:[%s2294_s1 + $0x2a8] sm:$0xff]  ;;  %v258_v18 = vrot.slane %v1493_v31, 1 }
  0x61   : > { %615 = vmatmul.f32.gmra.mxu1 %v244_v63  ;;  %923 = vmatpush.msra.mxu2 %v490_v19  ;;  %v486_v63 = vld [vmem:[%s2294_s1 + $0x330] sm:$0xff]  ;;  %v1904_v19 = vsel %vm293_vm0, %v310_v61, %v312_v8  ;;  %v268_v8 = vrot.slane %v1510_v36, 1 }
  0x62   : > { %1051 = vmatpush.msra.mxu0 %v524_v21  ;;  %988 = vmatpush.msra.mxu3 %v506_v22  ;;  %v1908_v21 = vsel %vm236_vm1, %v257_v14, %v258_v18  ;;  %v314_v22 = vrot.slane %v1448_v17, 2  ;;  %v325_v14 = vrot.slane %v1510_v36, 2 }
  0x63   : > { %745 = vmatmul.f32.gmra.mxu3 %v1445_v16  ;;  %807 = vmatmul.f32.gmra.mxu0 %v246_v23 }
  0x64   : > { %1052 = vmatpush.msra.mxu0 %v523_v25  ;;  %858 = vmatpush.msra.mxu1 %v474_v26  ;;  %v484_v25 = vld [vmem:[%s2294_s1 + $0x320] sm:$0xff] }
  0x65   : > { %924 = vmatpush.msra.mxu2 %v489_v27  ;;  %989 = vmatpush.msra.mxu3 %v505_v28  ;;  %v500_v26 = vld [vmem:[%s2294_s1 + $0x3a0] sm:$0xff]  ;;  %v260_v28 = vrot.slane %v196_v24, 1 }
  0x66   : > { %1053 = vmatpush.msra.mxu0 %v522_v29  ;;  %859 = vmatpush.msra.mxu1 %v473_v30  ;;  %v468_v27 = vld [vmem:[%s2294_s1 + $0x2a0] sm:$0xff] }
  0x67   : > { %925 = vmatpush.msra.mxu2 %v488_v41  ;;  %990 = vmatpush.msra.mxu3 %v504_v42  ;;  %v1933_v30 = vsel %vm236_vm1, %v258_v18, %v260_v28  ;;  %v262_v41 = vrot.slane %v1551_v49, 1  ;;  %v263_v42 = vrot.slane %v1615_v5, 1  ;;  %v202_v18 = vld [vmem:[%s1439_s22 + $0xa0] sm:$0x3] }
  0x68   : > { %683 = vmatmul.f32.gmra.mxu2 %v1807_v35  ;;  %1054 = vmatpush.msra.mxu0 %v521_v43  ;;  %v464_v24 = vld [vmem:[%s2294_s1 + $0x280] sm:$0xff] }
  0x69   : > { %618 = vmatmul.f32.gmra.mxu1 %v246_v23  ;;  %926 = vmatpush.msra.mxu2 %v487_v51  ;;  %v315_v23 = vrot.slane %v1493_v31, 2  ;;  %v199_v51 = vld [vmem:[%s1439_s22 + $0x88] sm:$0x3] }
  0x6a   : > { %860 = vmatpush.msra.mxu1 %v472_v44  ;;  %991 = vmatpush.msra.mxu3 %v503_v52  ;;  %v1957_v44 = vsel %vm236_vm1, %v262_v41, %v263_v42  ;;  %v482_v52 = vld [vmem:[%s2294_s1 + $0x310] sm:$0xff]  ;;  %v265_v57 = vrot.slane %v199_v51, 1  ;;  %v322_v62 = vrot.slane %v199_v51, 2  ;;  %v329_v51 = vrot.slane %v1574_v56, 2 }
  0x6b   : > { %748 = vmatmul.f32.gmra.mxu3 %v1496_v32  ;;  %810 = vmatmul.f32.gmra.mxu0 %v1811_v37  ;;  %v1929_v29 = vsel %vm293_vm0, %v314_v22, %v315_v23  ;;  %v1953_v43 = vsel %vm293_vm0, %v315_v23, %v317_v33  ;;  %v480_v22 = vld [vmem:[%s2294_s1 + $0x300] sm:$0xff]  ;;  %v327_v33 = vrot.slane %v202_v18, 2 }
  0x6c   : > { %1055 = vmatpush.msra.mxu0 %v520_v53  ;;  %861 = vmatpush.msra.mxu1 %v471_v54  ;;  %v498_v53 = vld [vmem:[%s2294_s1 + $0x390] sm:$0xff]  ;;  %v515_v54 = vld [vmem:[%s2294_s1 + $0x418] sm:$0xff]  ;;  %v1982_v61 = vsel %vm236_vm1, %v263_v42, %v265_v57  ;;  %v496_v23 = vld [vmem:[%s2294_s1 + $0x380] sm:$0xff] }
  0x6d   : > { %927 = vmatpush.msra.mxu2 %v486_v63  ;;  %992 = vmatpush.msra.mxu3 %v502_v0  ;;  %v481_v63 = vld [vmem:[%s2294_s1 + $0x308] sm:$0xff]  ;;  %v2050_v41 = vsel %vm293_vm0, %v325_v14, %v327_v33 }
  0x6e   : > { %1056 = vmatpush.msra.mxu0 %v519_v1  ;;  %862 = vmatpush.msra.mxu1 %v470_v2  ;;  %v497_v0 = vld [vmem:[%s2294_s1 + $0x388] sm:$0xff]  ;;  %v514_v1 = vld [vmem:[%s2294_s1 + $0x410] sm:$0xff] }
  0x6f   : > { %928 = vmatpush.msra.mxu2 %v485_v9  ;;  %993 = vmatpush.msra.mxu3 %v501_v10  ;;  %v465_v2 = vld [vmem:[%s2294_s1 + $0x288] sm:$0xff]  ;;  %v2002_v9 = vsel %vm293_vm0, %v320_v48, %v322_v62  ;;  %v2006_v10 = vsel %vm236_vm1, %v267_v3, %v268_v8 }
  0x70   : > { %686 = vmatmul.f32.gmra.mxu2 %v1831_v46  ;;  %1057 = vmatpush.msra.mxu0 %v518_v11  ;;  %v2082_v3 = vld [vmem:[%s1439_s22 + $0xc8] sm:$0xff] }
  0x71   : > { %621 = vmatmul.f32.gmra.mxu1 %v1811_v37  ;;  %929 = vmatpush.msra.mxu2 %v484_v25  ;;  %v270_v25 = vrot.slane %v202_v18, 1  ;;  %v354_v18 = vrot.slane %v2082_v3, 1 }
  0x72   : > { %863 = vmatpush.msra.mxu1 %v469_v13  ;;  %994 = vmatpush.msra.mxu3 %v500_v26  ;;  %v324_v13 = vrot.slane %v1457_v20, 2 }
  0x73   : > { %751 = vmatmul.f32.gmra.mxu3 %v1554_v50  ;;  %813 = vmatmul.f32.gmra.mxu0 %v1835_v47 }
  0x74   : > { %864 = vmatpush.msra.mxu1 %v468_v27  ;;  %930 = vmatpush.msra.mxu2 %v483_v34  ;;  %v2029_v26 = vsel %vm293_vm0, %v324_v13, %v325_v14 }
  0x75   : > { %995 = vmatpush.msra.mxu3 %v499_v38  ;;  %v512_v38 = vld [vmem:[%s2294_s1 + $0x400] sm:$0xff] }
  0x76   : > { %865 = vmatpush.msra.mxu1 %v467_v40  ;;  %931 = vmatpush.msra.mxu2 %v482_v52  ;;  %v273_v40 = vrot.slane %v1638_v12, 1  ;;  %v330_v52 = vrot.slane %v1638_v12, 2 }
  0x77   : > { %996 = vmatpush.msra.mxu3 %v498_v53  ;;  %v205_v53 = vld [vmem:[%s1439_s22 + $0xb8] sm:$0x3] }
  0x78   : > { %689 = vmatmul.f32.gmra.mxu2 %v1855_v58  ;;  %866 = vmatpush.msra.mxu1 %v466_v55  ;;  %v275_v57 = vrot.slane %v205_v53, 1  ;;  %v2069_v62 = vsel %vm293_vm0, %v329_v51, %v330_v52 }
  0x79   : > { %624 = vmatmul.f32.gmra.mxu1 %v1835_v47  ;;  %932 = vmatpush.msra.mxu2 %v481_v63 }
  0x7a   : > { %997 = vmatpush.msra.mxu3 %v497_v0  ;;  %867 = vmatpush.msra.mxu1 %v465_v2  ;;  %v2075_v0 = vld [vmem:[%s1439_s22 + $0xc0] sm:$0xff]  ;;  %v332_v2 = vrot.slane %v205_v53, 2 }
  0x7b   : > { %754 = vmatmul.f32.gmra.mxu3 %v1618_v6  ;;  %816 = vmatmul.f32.gmra.mxu0 %v1859_v59  ;;  %v353_v14 = vrot.slane %v2075_v0, 1 }
  0x7c   : > { %933 = vmatpush.msra.mxu2 %v480_v22  ;;  %998 = vmatpush.msra.mxu3 %v496_v23  ;;  %v2093_v22 = vsel %vm293_vm0, %v330_v52, %v332_v2 }
  0x7d   : > { %868 = vmatpush.msra.mxu1 %v464_v24 }
  0x80   : > { %692 = vmatmul.f32.gmra.mxu2 %v1880_v4 }
  0x81   : > { %627 = vmatmul.f32.gmra.mxu1 %v1859_v59 }
  0x83   : > { %757 = vmatmul.f32.gmra.mxu3 %v1448_v17  ;;  %819 = vmatmul.f32.gmra.mxu0 %v1884_v7  ;;  %v517_v17 = vld [vmem:[%s2294_s1 + $0x428] sm:$0xff] }
  0x84   : > { %1058 = vmatpush.msra.mxu0 %v517_v17  ;;  %v2035_v17 = vsel %vm236_vm1, %v268_v8, %v270_v25  ;;  %v2103_v25 = vld [vmem:[%s1439_s22 + $0xd0] sm:$0x3] }
  0x85   : > { %v356_v33 = vrot.slane %v2103_v25, 1 }
  0x86   : > { %1059 = vmatpush.msra.mxu0 %v516_v39  ;;  %v272_v39 = vrot.slane %v1574_v56, 1 }
  0x87   : > { %v2112_v51 = vsel %vm236_vm1, %v354_v18, %v356_v33 }
  0x88   : > { %695 = vmatmul.f32.gmra.mxu2 %v1904_v19  ;;  %1060 = vmatpush.msra.mxu0 %v515_v54  ;;  %v2056_v45 = vsel %vm236_vm1, %v272_v39, %v273_v40 }
  0x89   : > { %630 = vmatmul.f32.gmra.mxu1 %v1884_v7 }
  0x8a   : > { %1061 = vmatpush.msra.mxu0 %v514_v1  ;;  %v2078_v1 = vsel %vm236_vm1, %v273_v40, %v275_v57 }
  0x8b   : > { %760 = vmatmul.f32.gmra.mxu3 %v1493_v31  ;;  %822 = vmatmul.f32.gmra.mxu0 %v1908_v21 }
  0x90   : > { %698 = vmatmul.f32.gmra.mxu2 %v1929_v29 }
  0x91   : > { %633 = vmatmul.f32.gmra.mxu1 %v1908_v21 }
  0x93   : > { %763 = vmatmul.f32.gmra.mxu3 %v1551_v49  ;;  %825 = vmatmul.f32.gmra.mxu0 %v1933_v30 }
  0x98   : > { %701 = vmatmul.f32.gmra.mxu2 %v1953_v43 }
  0x99   : > { %636 = vmatmul.f32.gmra.mxu1 %v1933_v30 }
  0x9b   : > { %766 = vmatmul.f32.gmra.mxu3 %v1615_v5  ;;  %828 = vmatmul.f32.gmra.mxu0 %v1957_v44 }
  0xa0   : > { %704 = vmatmul.f32.gmra.mxu2 %v1978_v60 }
  0xa1   : > { %639 = vmatmul.f32.gmra.mxu1 %v1957_v44 }
  0xa3   : > { %769 = vmatmul.f32.gmra.mxu3 %v1457_v20  ;;  %831 = vmatmul.f32.gmra.mxu0 %v1982_v61  ;;  %v513_v20 = vld [vmem:[%s2294_s1 + $0x408] sm:$0xff] }
  0xa4   : > { %1062 = vmatpush.msra.mxu0 %v513_v20  ;;  %v2097_v20 = vsel %vm236_vm1, %v353_v14, %v354_v18 }
  0xa6   : > { %1063 = vmatpush.msra.mxu0 %v512_v38 }
  0xa8   : > { %707 = vmatmul.f32.gmra.mxu2 %v2002_v9  ;;  %v2008_v11 = vpop.f32.mrf.mxu1 }
  0xa9   : > { %642 = vmatmul.f32.gmra.mxu1 %v1982_v61 }
  0xab   : > { %772 = vmatmul.f32.gmra.mxu3 %v1510_v36  ;;  %834 = vmatmul.f32.gmra.mxu0 %v2006_v10 }
  0xae   : > { %v2031_v36 = vpop.f32.mrf.mxu2  ;;  %v545_v34 = vpop.f32.mrf.mxu0 }
  0xb0   : > { %710 = vmatmul.f32.gmra.mxu2 %v2029_v26  ;;  %v2037_v27 = vpop.f32.mrf.mxu3 }
  0xb1   : > { %645 = vmatmul.f32.gmra.mxu1 %v2006_v10  ;;  %v2040_v28 = vpop.f32.mrf.mxu1 }
  0xb3   : > { %775 = vmatmul.f32.gmra.mxu3 %v1574_v56  ;;  %837 = vmatmul.f32.gmra.mxu0 %v2035_v17 }
  0xb6   : > { %v2052_v42 = vpop.f32.mrf.mxu2 }
  0xb8   : > { %713 = vmatmul.f32.gmra.mxu2 %v2050_v41 }
  0xb9   : > { %648 = vmatmul.f32.gmra.mxu1 %v2035_v17  ;;  %v2059_v48 = vpop.f32.mrf.mxu3 }
  0xba   : > { %v2064_v54 = vpop.f32.mrf.mxu1 }
  0xbb   : > { %778 = vmatmul.f32.gmra.mxu3 %v1638_v12  ;;  %840 = vmatmul.f32.gmra.mxu0 %v2056_v45 }
  0xbc   : > { %v548_v55 = vpop.f32.mrf.mxu0 }
  0xbf   : > { %v2071_v63 = vpop.f32.mrf.mxu2 }
  0xc0   : > { %716 = vmatmul.f32.gmra.mxu2 %v2069_v62 }
  0xc1   : > { %651 = vmatmul.f32.gmra.mxu1 %v2056_v45 }
  0xc3   : > { %781 = vmatmul.f32.gmra.mxu3 %v2075_v0  ;;  %843 = vmatmul.f32.gmra.mxu0 %v2078_v1  ;;  %v2086_v8 = vpop.f32.mrf.mxu3 }
  0xc4   : > { %2297 = vst [vmem:[#allocation2_spill] sm:$0xff] %v2086_v8  ;;  %v2088_v13 = vpop.f32.mrf.mxu1 }
  0xc6   : > { %v551_v23 = vpop.f32.mrf.mxu0 }
  0xc8   : > { %719 = vmatmul.f32.gmra.mxu2 %v2093_v22 }
  0xc9   : > { %654 = vmatmul.f32.gmra.mxu1 %v2078_v1  ;;  %v2100_v24 = vpop.f32.mrf.mxu2 }
  0xcb   : > { %784 = vmatmul.f32.gmra.mxu3 %v2082_v3  ;;  %846 = vmatmul.f32.gmra.mxu0 %v2097_v20 }
  0xcd   : > { %v2108_v38 = vpop.f32.mrf.mxu3 }
  0xce   : > { %2298 = vst [vmem:[#allocation3_spill] sm:$0xff] %v2108_v38  ;;  %v610_v39 = vpop.f32.mrf.mxu1 }
  0xcf   : > { %v611_v52 = vadd.f32 %v610_v39, %v545_v34 }
  0xd0   : > { %v554_v40 = vpop.f32.mrf.mxu0  ;;  %934 = vmatmul.f32.vlgmr.msra.gmra.mxu2 %v1445_v16 }
  0xd1   : > { %869 = vmatmul.f32.vlgmr.msra.gmra.mxu1 %v1769_v15 }
  0xd3   : > { %849 = vmatmul.f32.gmra.mxu0 %v2112_v51  ;;  %999 = vmatmul.f32.vlgmr.msra.gmra.mxu3 %v1811_v37  ;;  %v675_v53 = vpop.f32.mrf.mxu2 }
  0xd4   : > { %v676_v57 = vadd.f32 %v675_v53, %v611_v52 }
  0xd6   : > { %v613_v2 = vpop.f32.mrf.mxu1  ;;  %v740_v14 = vpop.f32.mrf.mxu3 }
  0xd7   : > { %v2117_v8 = vadd.f32 %v740_v14, %v676_v57  ;;  %v614_v16 = vadd.f32 %v613_v2, %v548_v55 }
  0xd8   : > { %v2119_v38 = vpop.f32.mrf.mxu0  ;;  %937 = vmatmul.f32.gmra.mxu2 %v1496_v32 }
  0xd9   : > { %872 = vmatmul.f32.gmra.mxu1 %v1807_v35 }
  0xdb   : > { %1002 = vmatmul.f32.gmra.mxu3 %v1835_v47  ;;  %1064 = vmatmul.f32.vlgmr.msra.gmra.mxu0 %v1831_v46  ;;  %v678_v15 = vpop.f32.mrf.mxu2 }
  0xdc   : > { %v679_v34 = vadd.f32 %v678_v15, %v614_v16  ;;  %v1345_v15 = vld [vmem:[%s1439_s22 + $0x60] sm:$0xff] }
  0xde   : > { %v616_v37 = vpop.f32.mrf.mxu1  ;;  %v743_v18 = vpop.f32.mrf.mxu3 }
  0xdf   : > { %v2125_v33 = vadd.f32 %v743_v18, %v679_v34  ;;  %v617_v32 = vadd.f32 %v616_v37, %v551_v23 }
  0xe0   : > { %v2127_v39 = vpop.f32.mrf.mxu0  ;;  %940 = vmatmul.f32.gmra.mxu2 %v1554_v50 }
  0xe1   : > { %875 = vmatmul.f32.gmra.mxu1 %v1831_v46 }
  0xe3   : > { %1005 = vmatmul.f32.gmra.mxu3 %v1859_v59  ;;  %1067 = vmatmul.f32.gmra.mxu0 %v1855_v58  ;;  %v681_v35 = vpop.f32.mrf.mxu2 }
  0xe4   : > { %v682_v47 = vadd.f32 %v681_v35, %v617_v32 }
  0xe6   : > { %v619_v55 = vpop.f32.mrf.mxu1  ;;  %v746_v52 = vpop.f32.mrf.mxu3 }
  0xe7   : > { %v2133_v53 = vadd.f32 %v746_v52, %v682_v47  ;;  %v620_v50 = vadd.f32 %v619_v55, %v554_v40 }
  0xe8   : > { %v2135_v57 = vpop.f32.mrf.mxu0  ;;  %943 = vmatmul.f32.gmra.mxu2 %v1618_v6 }
  0xe9   : > { %878 = vmatmul.f32.gmra.mxu1 %v1855_v58 }
  0xeb   : > { %1008 = vmatmul.f32.gmra.mxu3 %v1884_v7  ;;  %1070 = vmatmul.f32.gmra.mxu0 %v1880_v4  ;;  %v684_v46 = vpop.f32.mrf.mxu2 }
  0xec   : > { %v685_v59 = vadd.f32 %v684_v46, %v620_v50 }
  0xee   : > { %v622_v23 = vpop.f32.mrf.mxu1  ;;  %v749_v2 = vpop.f32.mrf.mxu3 }
  0xef   : > { %v2141_v14 = vadd.f32 %v749_v2, %v685_v59  ;;  %v623_v6 = vadd.f32 %v622_v23, %v2008_v11 }
  0xf0   : > { %v2143_v16 = vpop.f32.mrf.mxu0  ;;  %946 = vmatmul.f32.gmra.mxu2 %v1345_v15  ;;  %v1346_v15 = vld [vmem:[%s1439_s22 + $0x90] sm:$0xff] }
  0xf1   : > { %881 = vmatmul.f32.gmra.mxu1 %v1880_v4 }
  0xf3   : > { %1011 = vmatmul.f32.gmra.mxu3 %v1908_v21  ;;  %1073 = vmatmul.f32.gmra.mxu0 %v1904_v19  ;;  %v687_v58 = vpop.f32.mrf.mxu2 }
  0xf4   : > { %v688_v7 = vadd.f32 %v687_v58, %v623_v6 }
  0xf6   : > { %v625_v40 = vpop.f32.mrf.mxu1  ;;  %v752_v34 = vpop.f32.mrf.mxu3 }
  0xf7   : > { %v2150_v37 = vadd.f32 %v752_v34, %v688_v7  ;;  %v626_v4 = vadd.f32 %v625_v40, %v2040_v28  ;;  %v1347_v40 = vld [vmem:[%s1439_s22 + $0x98] sm:$0xff] }
  0xf8   : > { %v2152_v18 = vpop.f32.mrf.mxu0  ;;  %949 = vmatmul.f32.gmra.mxu2 %v1493_v31 }
  0xf9   : > { %884 = vmatmul.f32.gmra.mxu1 %v1904_v19 }
  0xfb   : > { %1014 = vmatmul.f32.gmra.mxu3 %v1933_v30  ;;  %1076 = vmatmul.f32.gmra.mxu0 %v1929_v29  ;;  %v690_v21 = vpop.f32.mrf.mxu2 }
  0xfc   : > { %v691_v11 = vadd.f32 %v690_v21, %v626_v4 }
  0xfe   : > { %v628_v32 = vpop.f32.mrf.mxu1  ;;  %v755_v35 = vpop.f32.mrf.mxu3 }
  0xff   : > { %v2159_v47 = vadd.f32 %v755_v35, %v691_v11  ;;  %v629_v31 = vadd.f32 %v628_v32, %v2064_v54 }
 0x100   : > { %v2161_v55 = vpop.f32.mrf.mxu0  ;;  %952 = vmatmul.f32.gmra.mxu2 %v1551_v49 }
 0x101   : > { %887 = vmatmul.f32.gmra.mxu1 %v1929_v29 }
 0x103   : > { %1017 = vmatmul.f32.gmra.mxu3 %v1957_v44  ;;  %1079 = vmatmul.f32.gmra.mxu0 %v1953_v43  ;;  %v693_v19 = vpop.f32.mrf.mxu2 }
 0x104   : > { %v694_v30 = vadd.f32 %v693_v19, %v629_v31 }
 0x106   : > { %v631_v28 = vpop.f32.mrf.mxu1  ;;  %v758_v52 = vpop.f32.mrf.mxu3 }
 0x107   : > { %v2168_v50 = vadd.f32 %v758_v52, %v694_v30  ;;  %v632_v49 = vadd.f32 %v631_v28, %v2088_v13 }
 0x108   : > { %v2170_v46 = vpop.f32.mrf.mxu0  ;;  %955 = vmatmul.f32.gmra.mxu2 %v1615_v5 }
 0x109   : > { %890 = vmatmul.f32.gmra.mxu1 %v1953_v43 }
 0x10b   : > { %1020 = vmatmul.f32.gmra.mxu3 %v1982_v61  ;;  %1082 = vmatmul.f32.gmra.mxu0 %v1978_v60  ;;  %v696_v29 = vpop.f32.mrf.mxu2 }
 0x10c   : > { %v697_v44 = vadd.f32 %v696_v29, %v632_v49 }
 0x10e   : > { %v634_v54 = vpop.f32.mrf.mxu1  ;;  %v761_v59 = vpop.f32.mrf.mxu3 }
 0x10f   : > { %v2177_v23 = vadd.f32 %v761_v59, %v697_v44  ;;  %v635_v5 = vadd.f32 %v634_v54, %v2031_v36  ;;  %v361_v59 = vrot.slane %v2082_v3, 2 }
 0x110   : > { %v2179_v2 = vpop.f32.mrf.mxu0  ;;  %958 = vmatmul.f32.gmra.mxu2 %v1346_v15 }
 0x111   : > { %893 = vmatmul.f32.gmra.mxu1 %v1978_v60 }
 0x113   : > { %1023 = vmatmul.f32.gmra.mxu3 %v2006_v10  ;;  %1085 = vmatmul.f32.gmra.mxu0 %v2002_v9  ;;  %v699_v43 = vpop.f32.mrf.mxu2 }
 0x114   : > { %v700_v61 = vadd.f32 %v699_v43, %v635_v5 }
 0x116   : > { %v637_v13 = vpop.f32.mrf.mxu1  ;;  %v764_v6 = vpop.f32.mrf.mxu3 }
 0x117   : > { %v765_v58 = vadd.f32 %v764_v6, %v700_v61  ;;  %v638_v60 = vadd.f32 %v637_v13, %v2052_v42  ;;  %v210_v13 = vld [vmem:[%s1439_s22 + $0xe0] sm:$0xff] }
 0x118   : > { %v829_v7 = vpop.f32.mrf.mxu0  ;;  %961 = vmatmul.f32.gmra.mxu2 %v1347_v40  ;;  %v371_v40 = vrot.slane %v210_v13, 1 }
 0x119   : > { %v2187_v34 = vadd.f32 %v829_v7, %v765_v58  ;;  %896 = vmatmul.f32.gmra.mxu1 %v2002_v9 }
 0x11b   : > { %1026 = vmatmul.f32.gmra.mxu3 %v2035_v17  ;;  %1088 = vmatmul.f32.gmra.mxu0 %v2029_v26  ;;  %v702_v10 = vpop.f32.mrf.mxu2 }
 0x11c   : > { %v703_v36 = vadd.f32 %v702_v10, %v638_v60 }
 0x11e   : > { %v640_v4 = vpop.f32.mrf.mxu1  ;;  %v767_v21 = vpop.f32.mrf.mxu3 }
 0x11f   : > { %v768_v11 = vadd.f32 %v767_v21, %v703_v36  ;;  %v641_v9 = vadd.f32 %v640_v4, %v2071_v63 }
 0x120   : > { %v832_v32 = vpop.f32.mrf.mxu0  ;;  %964 = vmatmul.f32.gmra.mxu2 %v1574_v56 }
 0x121   : > { %v2194_v35 = vadd.f32 %v832_v32, %v768_v11  ;;  %899 = vmatmul.f32.gmra.mxu1 %v2029_v26  ;;  %v2299_v11 = vld [vmem:[#allocation2_spill] sm:$0xff] }
 0x123   : > { %1029 = vmatmul.f32.gmra.mxu3 %v2056_v45  ;;  %1091 = vmatmul.f32.gmra.mxu0 %v2050_v41  ;;  %v705_v17 = vpop.f32.mrf.mxu2 }
 0x124   : > { %v706_v42 = vadd.f32 %v705_v17, %v641_v9 }
 0x126   : > { %v643_v31 = vpop.f32.mrf.mxu1  ;;  %v770_v19 = vpop.f32.mrf.mxu3 }
 0x127   : > { %v771_v30 = vadd.f32 %v770_v19, %v706_v42  ;;  %v644_v56 = vadd.f32 %v643_v31, %v2100_v24  ;;  %v360_v24 = vrot.slane %v2075_v0, 2  ;;  %v378_v31 = vrot.slane %v210_v13, 2 }
 0x128   : > { %v835_v28 = vpop.f32.mrf.mxu0  ;;  %967 = vmatmul.f32.gmra.mxu2 %v1638_v12 }
 0x129   : > { %v2201_v52 = vadd.f32 %v835_v28, %v771_v30  ;;  %902 = vmatmul.f32.gmra.mxu1 %v2050_v41 }
 0x12b   : > { %1032 = vmatmul.f32.gmra.mxu3 %v2078_v1  ;;  %1094 = vmatmul.f32.gmra.mxu0 %v2069_v62  ;;  %v708_v26 = vpop.f32.mrf.mxu2 }
 0x12c   : > { %v709_v45 = vadd.f32 %v708_v26, %v644_v56 }
 0x12e   : > { %v646_v63 = vpop.f32.mrf.mxu1  ;;  %v773_v49 = vpop.f32.mrf.mxu3 }
 0x12f   : > { %v774_v29 = vadd.f32 %v773_v49, %v709_v45  ;;  %v647_v12 = vadd.f32 %v646_v63, %v2037_v27  ;;  %v2300_v49 = vld [vmem:[#allocation3_spill] sm:$0xff] }
 0x130   : > { %v838_v44 = vpop.f32.mrf.mxu0  ;;  %970 = vmatmul.f32.gmra.mxu2 %v2075_v0 }
 0x131   : > { %v2208_v54 = vadd.f32 %v838_v44, %v774_v29  ;;  %905 = vmatmul.f32.gmra.mxu1 %v2069_v62  ;;  %v362_v62 = vsel %vm293_vm0, %v360_v24, %v361_v59 }
 0x133   : > { %1035 = vmatmul.f32.gmra.mxu3 %v2097_v20  ;;  %1097 = vmatmul.f32.gmra.mxu0 %v2093_v22  ;;  %v711_v41 = vpop.f32.mrf.mxu2  ;;  %v209_v20 = vld [vmem:[%s1439_s22 + $0xd8] sm:$0xff] }
 0x134   : > { %v712_v1 = vadd.f32 %v711_v41, %v647_v12  ;;  %v370_v7 = vrot.slane %v209_v20, 1  ;;  %v377_v17 = vrot.slane %v209_v20, 2 }
 0x136   : > { %v649_v15 = vpop.f32.mrf.mxu1  ;;  %v776_v5 = vpop.f32.mrf.mxu3  ;;  %v379_v45 = vsel %vm293_vm0, %v377_v17, %v378_v31 }
 0x137   : > { %v777_v43 = vadd.f32 %v776_v5, %v712_v1  ;;  %v650_v6 = vadd.f32 %v649_v15, %v2059_v48  ;;  %v806_v15 = vadd.f32 %v2119_v38, %v2117_v8 }
 0x138   : > { %v841_v61 = vpop.f32.mrf.mxu0  ;;  %973 = vmatmul.f32.gmra.mxu2 %v2082_v3  ;;  %v363_v3 = vrot.slane %v2103_v25, 2 }
 0x139   : > { %v2218_v27 = vadd.f32 %v841_v61, %v777_v43  ;;  %908 = vmatmul.f32.gmra.mxu1 %v2093_v22  ;;  %v372_v22 = vsel %vm236_vm1, %v370_v7, %v371_v40  ;;  %v809_v7 = vadd.f32 %v2127_v39, %v2125_v33 }
 0x13a   : > { %v364_v21 = vsel %vm293_vm0, %v361_v59, %v363_v3 }
 0x13b   : > { %1038 = vmatmul.f32.gmra.mxu3 %v2112_v51  ;;  %1100 = vmatmul.f32.gmra.mxu0 %v362_v62  ;;  %v714_v0 = vpop.f32.mrf.mxu2  ;;  %v211_v51 = vld [vmem:[%s1439_s22 + $0xe8] sm:$0x3]  ;;  %s1287_s22 = sshll.u32 %s2302_s13, 7 }
 0x13c   : > { %v715_v58 = vadd.f32 %v714_v0, %v650_v6  ;;  %v373_v42 = vrot.slane %v211_v51, 1  ;;  %v380_v41 = vrot.slane %v211_v51, 2  ;;  %s2248_s18 = scalar_lea.vmem %s2295_s2, %s1287_s22 }
 0x13e   : > { %v652_v60 = vpop.f32.mrf.mxu1  ;;  %v779_v10 = vpop.f32.mrf.mxu3  ;;  %v374_v26 = vsel %vm236_vm1, %v371_v40, %v373_v42  ;;  %v381_v43 = vsel %vm293_vm0, %v378_v31, %v380_v41 }
 0x13f   : > { %v780_v36 = vadd.f32 %v779_v10, %v715_v58  ;;  %v653_v32 = vadd.f32 %v652_v60, %v2299_v11 }
 0x140   : > { %v844_v4 = vpop.f32.mrf.mxu0  ;;  %976 = vmatmul.f32.gmra.mxu2 %v209_v20 }
 0x141   : > { %v2228_v48 = vadd.f32 %v844_v4, %v780_v36  ;;  %911 = vmatmul.f32.gmra.mxu1 %v362_v62 }
 0x143   : > { %1041 = vmatmul.f32.gmra.mxu3 %v372_v22  ;;  %1103 = vmatmul.f32.gmra.mxu0 %v364_v21  ;;  %v717_v9 = vpop.f32.mrf.mxu2  ;;  %v812_v22 = vadd.f32 %v2135_v57, %v2133_v53 }
 0x144   : > { %v718_v25 = vadd.f32 %v717_v9, %v653_v32 }
 0x146   : > { %v655_v19 = vpop.f32.mrf.mxu1  ;;  %v782_v30 = vpop.f32.mrf.mxu3 }
 0x147   : > { %v783_v28 = vadd.f32 %v782_v30, %v718_v25  ;;  %v656_v29 = vadd.f32 %v655_v19, %v2300_v49  ;;  %v815_v30 = vadd.f32 %v2143_v16, %v2141_v14 }
 0x148   : > { %v847_v56 = vpop.f32.mrf.mxu0  ;;  %979 = vmatmul.f32.gmra.mxu2 %v210_v13 }
 0x149   : > { %v2234_v63 = vadd.f32 %v847_v56, %v783_v28  ;;  %914 = vmatmul.f32.gmra.mxu1 %v364_v21 }
 0x14b   : > { %1044 = vmatmul.f32.gmra.mxu3 %v374_v26  ;;  %1106 = vmatmul.f32.gmra.mxu0 %v379_v45  ;;  %v720_v44 = vpop.f32.mrf.mxu2 }
 0x14c   : > { %v721_v12 = vadd.f32 %v720_v44, %v656_v29 }
 0x14e   : > { %v785_v1 = vpop.f32.mrf.mxu3  ;;  %v870_v24 = vpop.f32.mrf.mxu1 }
 0x14f   : > { %v786_v59 = vadd.f32 %v785_v1, %v721_v12  ;;  %v871_v62 = vadd.f32 %v870_v24, %v806_v15  ;;  %v818_v1 = vadd.f32 %v2152_v18, %v2150_v37 }
 0x150   : > { %v850_v5 = vpop.f32.mrf.mxu0 }
 0x151   : > { %v2240_v61 = vadd.f32 %v850_v5, %v786_v59 }
 0x153   : > { %1109 = vmatmul.f32.gmra.mxu0 %v381_v43  ;;  %v935_v20 = vpop.f32.mrf.mxu2 }
 0x154   : > { %v936_v13 = vadd.f32 %v935_v20, %v871_v62 }
 0x156   : > { %v873_v6 = vpop.f32.mrf.mxu1  ;;  %v1000_v0 = vpop.f32.mrf.mxu3 }
 0x157   : > { %v1001_v58 = vadd.f32 %v1000_v0, %v936_v13  ;;  %v874_v40 = vadd.f32 %v873_v6, %v809_v7  ;;  %v821_v0 = vadd.f32 %v2161_v55, %v2159_v47 }
 0x158   : > { %v1065_v8 = vpop.f32.mrf.mxu0 }
 0x159   : > { %v1066_v38 = vadd.f32 %v1065_v8, %v1001_v58 }
 0x15b   : > { %1113 = vst [vmem:[%s2248_s18] sm:$0xff] %v1066_v38  ;;  %v938_v3 = vpop.f32.mrf.mxu2  ;;  %v1150_v51 = vmul.f32 %v1066_v38, %v1066_v38 }
 0x15c   : > { %v939_v60 = vadd.f32 %v938_v3, %v874_v40 }
 0x15e   : > { %v876_v10 = vpop.f32.mrf.mxu1  ;;  %v1003_v36 = vpop.f32.mrf.mxu3 }
 0x15f   : > { %v1004_v4 = vadd.f32 %v1003_v36, %v939_v60  ;;  %v877_v21 = vadd.f32 %v876_v10, %v812_v22 }
 0x160   : > { %v1068_v33 = vpop.f32.mrf.mxu0 }
 0x161   : > { %v1069_v39 = vadd.f32 %v1068_v33, %v1004_v4  ;;  %v824_v4 = vadd.f32 %v2170_v46, %v2168_v50 }
 0x163   : > { %1114 = vst [vmem:[%s2248_s18 + $0x8] sm:$0xff] %v1069_v39  ;;  %v1129_v11 = vadd.f32 %v1069_v39, %v1066_v38  ;;  %v1151_v32 = vmul.f32 %v1069_v39, %v1069_v39  ;;  %v941_v9 = vpop.f32.mrf.mxu2 }
 0x164   : > { %v942_v17 = vadd.f32 %v941_v9, %v877_v21 }
 0x165   : > { %v1166_v25 = vadd.f32 %v1151_v32, %v1150_v51 }
 0x166   : > { %v879_v42 = vpop.f32.mrf.mxu1  ;;  %v1006_v31 = vpop.f32.mrf.mxu3 }
 0x167   : > { %v1007_v19 = vadd.f32 %v1006_v31, %v942_v17  ;;  %v880_v57 = vadd.f32 %v879_v42, %v815_v30 }
 0x168   : > { %v1071_v28 = vpop.f32.mrf.mxu0 }
 0x169   : > { %v1072_v53 = vadd.f32 %v1071_v28, %v1007_v19 }
 0x16b   : > { %1115 = vst [vmem:[%s2248_s18 + $0x10] sm:$0xff] %v1072_v53  ;;  %v1130_v56 = vadd.f32 %v1129_v11, %v1072_v53  ;;  %v1152_v26 = vmul.f32 %v1072_v53, %v1072_v53  ;;  %v944_v45 = vpop.f32.mrf.mxu2 }
 0x16c   : > { %v945_v49 = vadd.f32 %v944_v45, %v880_v57 }
 0x16d   : > { %v1167_v29 = vadd.f32 %v1166_v25, %v1152_v26  ;;  %v827_v25 = vadd.f32 %v2179_v2, %v2177_v23 }
 0x16e   : > { %v882_v44 = vpop.f32.mrf.mxu1  ;;  %v1009_v12 = vpop.f32.mrf.mxu3 }
 0x16f   : > { %v1010_v41 = vadd.f32 %v1009_v12, %v945_v49  ;;  %v883_v14 = vadd.f32 %v882_v44, %v818_v1 }
 0x170   : > { %v1074_v24 = vpop.f32.mrf.mxu0 }
 0x171   : > { %v1075_v59 = vadd.f32 %v1074_v24, %v1010_v41 }
 0x173   : > { %1116 = vst [vmem:[%s2248_s18 + $0x18] sm:$0xff] %v1075_v59  ;;  %v1131_v16 = vadd.f32 %v1130_v56, %v1075_v59  ;;  %v1153_v15 = vmul.f32 %v1075_v59, %v1075_v59  ;;  %v947_v5 = vpop.f32.mrf.mxu2 }
 0x174   : > { %v948_v43 = vadd.f32 %v947_v5, %v883_v14 }
 0x175   : > { %v1168_v62 = vadd.f32 %v1167_v29, %v1153_v15 }
 0x176   : > { %v885_v20 = vpop.f32.mrf.mxu1  ;;  %v1012_v13 = vpop.f32.mrf.mxu3 }
 0x177   : > { %v1013_v6 = vadd.f32 %v1012_v13, %v948_v43  ;;  %v886_v37 = vadd.f32 %v885_v20, %v821_v0 }
 0x178   : > { %v1077_v58 = vpop.f32.mrf.mxu0 }
 0x179   : > { %v1078_v7 = vadd.f32 %v1077_v58, %v1013_v6 }
 0x17b   : > { %1117 = vst [vmem:[%s2248_s18 + $0x20] sm:$0xff] %v1078_v7  ;;  %v1132_v18 = vadd.f32 %v1131_v16, %v1078_v7  ;;  %v1154_v8 = vmul.f32 %v1078_v7, %v1078_v7  ;;  %v950_v38 = vpop.f32.mrf.mxu2 }
 0x17c   : > { %v951_v40 = vadd.f32 %v950_v38, %v886_v37 }
 0x17d   : > { %v1169_v3 = vadd.f32 %v1168_v62, %v1154_v8 }
 0x17e   : > { %v888_v60 = vpop.f32.mrf.mxu1  ;;  %v1015_v10 = vpop.f32.mrf.mxu3 }
 0x17f   : > { %v1016_v36 = vadd.f32 %v1015_v10, %v951_v40  ;;  %v889_v47 = vadd.f32 %v888_v60, %v824_v4 }
 0x180   : > { %v1080_v22 = vpop.f32.mrf.mxu0 }
 0x181   : > { %v1081_v33 = vadd.f32 %v1080_v22, %v1016_v36 }
 0x183   : > { %1118 = vst [vmem:[%s2248_s18 + $0x28] sm:$0xff] %v1081_v33  ;;  %v1133_v55 = vadd.f32 %v1132_v18, %v1081_v33  ;;  %v1155_v39 = vmul.f32 %v1081_v33, %v1081_v33  ;;  %v953_v21 = vpop.f32.mrf.mxu2 }
 0x184   : > { %v954_v51 = vadd.f32 %v953_v21, %v889_v47 }
 0x185   : > { %v1170_v11 = vadd.f32 %v1169_v3, %v1155_v39 }
 0x186   : > { %v891_v32 = vpop.f32.mrf.mxu1  ;;  %v1018_v9 = vpop.f32.mrf.mxu3 }
 0x187   : > { %v1019_v17 = vadd.f32 %v1018_v9, %v954_v51  ;;  %v892_v50 = vadd.f32 %v891_v32, %v827_v25 }
 0x188   : > { %v1083_v42 = vpop.f32.mrf.mxu0 }
 0x189   : > { %v1084_v31 = vadd.f32 %v1083_v42, %v1019_v17 }
 0x18b   : > { %1119 = vst [vmem:[%s2248_s18 + $0x30] sm:$0xff] %v1084_v31  ;;  %v1134_v46 = vadd.f32 %v1133_v55, %v1084_v31  ;;  %v1156_v19 = vmul.f32 %v1084_v31, %v1084_v31  ;;  %v956_v30 = vpop.f32.mrf.mxu2 }
 0x18c   : > { %v957_v28 = vadd.f32 %v956_v30, %v892_v50 }
 0x18d   : > { %v1171_v53 = vadd.f32 %v1170_v11, %v1156_v19 }
 0x18e   : > { %v894_v57 = vpop.f32.mrf.mxu1  ;;  %v1021_v56 = vpop.f32.mrf.mxu3 }
 0x18f   : > { %v1022_v26 = vadd.f32 %v1021_v56, %v957_v28  ;;  %v895_v29 = vadd.f32 %v894_v57, %v2187_v34 }
 0x190   : > { %v1086_v45 = vpop.f32.mrf.mxu0 }
 0x191   : > { %v1087_v49 = vadd.f32 %v1086_v45, %v1022_v26 }
 0x193   : > { %1120 = vst [vmem:[%s2248_s18 + $0x38] sm:$0xff] %v1087_v49  ;;  %v1135_v23 = vadd.f32 %v1134_v46, %v1087_v49  ;;  %v1157_v2 = vmul.f32 %v1087_v49, %v1087_v49  ;;  %v959_v44 = vpop.f32.mrf.mxu2 }
 0x194   : > { %v960_v12 = vadd.f32 %v959_v44, %v895_v29 }
 0x195   : > { %v1172_v41 = vadd.f32 %v1171_v53, %v1157_v2 }
 0x196   : > { %v897_v1 = vpop.f32.mrf.mxu1  ;;  %v1024_v24 = vpop.f32.mrf.mxu3 }
 0x197   : > { %v1025_v59 = vadd.f32 %v1024_v24, %v960_v12  ;;  %v898_v15 = vadd.f32 %v897_v1, %v2194_v35 }
 0x198   : > { %v1089_v14 = vpop.f32.mrf.mxu0 }
 0x199   : > { %v1090_v16 = vadd.f32 %v1089_v14, %v1025_v59 }
 0x19b   : > { %1121 = vst [vmem:[%s2248_s18 + $0x40] sm:$0xff] %v1090_v16  ;;  %v1136_v5 = vadd.f32 %v1135_v23, %v1090_v16  ;;  %v1158_v43 = vmul.f32 %v1090_v16, %v1090_v16  ;;  %v962_v62 = vpop.f32.mrf.mxu2 }
 0x19c   : > { %v963_v20 = vadd.f32 %v962_v62, %v898_v15 }
 0x19d   : > { %v1173_v34 = vadd.f32 %v1172_v41, %v1158_v43 }
 0x19e   : > { %v900_v13 = vpop.f32.mrf.mxu1  ;;  %v1027_v6 = vpop.f32.mrf.mxu3 }
 0x19f   : > { %v1028_v0 = vadd.f32 %v1027_v6, %v963_v20  ;;  %v901_v37 = vadd.f32 %v900_v13, %v2201_v52 }
 0x1a0   : > { %v1092_v58 = vpop.f32.mrf.mxu0 }
 0x1a1   : > { %v1093_v7 = vadd.f32 %v1092_v58, %v1028_v0 }
 0x1a3   : > { %1122 = vst [vmem:[%s2248_s18 + $0x48] sm:$0xff] %v1093_v7  ;;  %v1137_v18 = vadd.f32 %v1136_v5, %v1093_v7  ;;  %v1159_v8 = vmul.f32 %v1093_v7, %v1093_v7  ;;  %v965_v38 = vpop.f32.mrf.mxu2 }
 0x1a4   : > { %v966_v40 = vadd.f32 %v965_v38, %v901_v37 }
 0x1a5   : > { %v1174_v35 = vadd.f32 %v1173_v34, %v1159_v8 }
 0x1a6   : > { %v903_v3 = vpop.f32.mrf.mxu1  ;;  %v1030_v60 = vpop.f32.mrf.mxu3 }
 0x1a7   : > { %v1031_v10 = vadd.f32 %v1030_v60, %v966_v40  ;;  %v904_v22 = vadd.f32 %v903_v3, %v2208_v54 }
 0x1a8   : > { %v1095_v36 = vpop.f32.mrf.mxu0 }
 0x1a9   : > { %v1096_v4 = vadd.f32 %v1095_v36, %v1031_v10 }
 0x1ab   : > { %1123 = vst [vmem:[%s2248_s18 + $0x50] sm:$0xff] %v1096_v4  ;;  %v1138_v33 = vadd.f32 %v1137_v18, %v1096_v4  ;;  %v1160_v47 = vmul.f32 %v1096_v4, %v1096_v4  ;;  %v968_v55 = vpop.f32.mrf.mxu2 }
 0x1ac   : > { %v969_v39 = vadd.f32 %v968_v55, %v904_v22 }
 0x1ad   : > { %v1175_v52 = vadd.f32 %v1174_v35, %v1160_v47 }
 0x1ae   : > { %v906_v21 = vpop.f32.mrf.mxu1  ;;  %v1033_v51 = vpop.f32.mrf.mxu3 }
 0x1af   : > { %v1034_v11 = vadd.f32 %v1033_v51, %v969_v39  ;;  %v907_v17 = vadd.f32 %v906_v21, %v2218_v27 }
 0x1b0   : > { %v1098_v32 = vpop.f32.mrf.mxu0 }
 0x1b1   : > { %v1099_v9 = vadd.f32 %v1098_v32, %v1034_v11 }
 0x1b3   : > { %1124 = vst [vmem:[%s2248_s18 + $0x58] sm:$0xff] %v1099_v9  ;;  %v1139_v25 = vadd.f32 %v1138_v33, %v1099_v9  ;;  %v1161_v42 = vmul.f32 %v1099_v9, %v1099_v9  ;;  %v971_v31 = vpop.f32.mrf.mxu2 }
 0x1b4   : > { %v972_v50 = vadd.f32 %v971_v31, %v907_v17 }
 0x1b5   : > { %v1176_v54 = vadd.f32 %v1175_v52, %v1161_v42 }
 0x1b6   : > { %v909_v46 = vpop.f32.mrf.mxu1  ;;  %v1036_v19 = vpop.f32.mrf.mxu3 }
 0x1b7   : > { %v1037_v30 = vadd.f32 %v1036_v19, %v972_v50  ;;  %v910_v57 = vadd.f32 %v909_v46, %v2228_v48 }
 0x1b8   : > { %v1101_v28 = vpop.f32.mrf.mxu0 }
 0x1b9   : > { %v1102_v53 = vadd.f32 %v1101_v28, %v1037_v30 }
 0x1bb   : > { %1125 = vst [vmem:[%s2248_s18 + $0x60] sm:$0xff] %v1102_v53  ;;  %v1140_v56 = vadd.f32 %v1139_v25, %v1102_v53  ;;  %v1162_v26 = vmul.f32 %v1102_v53, %v1102_v53  ;;  %v974_v45 = vpop.f32.mrf.mxu2 }
 0x1bc   : > { %v975_v49 = vadd.f32 %v974_v45, %v910_v57 }
 0x1bd   : > { %v1177_v27 = vadd.f32 %v1176_v54, %v1162_v26 }
 0x1be   : > { %v912_v29 = vpop.f32.mrf.mxu1  ;;  %v1039_v23 = vpop.f32.mrf.mxu3 }
 0x1bf   : > { %v1040_v2 = vadd.f32 %v1039_v23, %v975_v49  ;;  %v913_v41 = vadd.f32 %v912_v29, %v2234_v63 }
 0x1c0   : > { %v1104_v44 = vpop.f32.mrf.mxu0 }
 0x1c1   : > { %v1105_v12 = vadd.f32 %v1104_v44, %v1040_v2 }
 0x1c3   : > { %1126 = vst [vmem:[%s2248_s18 + $0x68] sm:$0xff] %v1105_v12  ;;  %v1141_v1 = vadd.f32 %v1140_v56, %v1105_v12  ;;  %v1163_v24 = vmul.f32 %v1105_v12, %v1105_v12  ;;  %v977_v59 = vpop.f32.mrf.mxu2 }
 0x1c4   : > { %v978_v14 = vadd.f32 %v977_v59, %v913_v41 }
 0x1c5   : > { %v1178_v48 = vadd.f32 %v1177_v27, %v1163_v24 }
 0x1c6   : > { %v1042_v16 = vpop.f32.mrf.mxu3  ;;  %v915_v15 = vpop.f32.mrf.mxu1 }
 0x1c7   : > { %v1043_v5 = vadd.f32 %v1042_v16, %v978_v14  ;;  %v916_v20 = vadd.f32 %v915_v15, %v2240_v61 }
 0x1c8   : > { %v1107_v43 = vpop.f32.mrf.mxu0 }
 0x1c9   : > { %v1108_v62 = vadd.f32 %v1107_v43, %v1043_v5 }
 0x1cb   : > { %1127 = vst [vmem:[%s2248_s18 + $0x70] sm:$0xff] %v1108_v62  ;;  %v1142_v34 = vadd.f32 %v1141_v1, %v1108_v62  ;;  %v1164_v13 = vmul.f32 %v1108_v62, %v1108_v62  ;;  %v980_v6 = vpop.f32.mrf.mxu2 }
 0x1cc   : > { %v981_v0 = vadd.f32 %v980_v6, %v916_v20 }
 0x1cd   : > { %v1179_v63 = vadd.f32 %v1178_v48, %v1164_v13 }
 0x1ce   : > { %v1045_v58 = vpop.f32.mrf.mxu3 }
 0x1cf   : > { %v1046_v7 = vadd.f32 %v1045_v58, %v981_v0 }
 0x1d0   : > { %v1110_v37 = vpop.f32.mrf.mxu0 }
 0x1d1   : > { %v1111_v18 = vadd.f32 %v1110_v37, %v1046_v7 }
 0x1d3   : > { %1128 = vst [vmem:[%s2248_s18 + $0x78] sm:$0xff] %v1111_v18  ;;  %v1143_v8 = vadd.f32 %v1142_v34, %v1111_v18  ;;  %v1165_v38 = vmul.f32 %v1111_v18, %v1111_v18 }
 0x1d5   : > { %v1144_v40 = vrot.slane %v1143_v8, 4  ;;  %v1180_v35 = vadd.f32 %v1179_v63, %v1165_v38 }
 0x1d7   : > { %v1145_v3 = vadd.f32 %v1144_v40, %v1143_v8  ;;  %v1181_v60 = vrot.slane %v1180_v35, 4 }
 0x1d9   : > { %v1146_v10 = vrot.slane %v1145_v3, 2  ;;  %v1182_v61 = vadd.f32 %v1181_v60, %v1180_v35 }
 0x1db   : > { %v1147_v36 = vadd.f32 %v1146_v10, %v1145_v3  ;;  %v1183_v4 = vrot.slane %v1182_v61, 2 }
 0x1dd   : > { %v1148_v22 = vrot.slane %v1147_v36, 1  ;;  %v1184_v33 = vadd.f32 %v1183_v4, %v1182_v61 }
 0x1df   : > { %v1185_v47 = vrot.slane %v1184_v33, 1  ;;  %v1149_v55 = vadd.f32 %v1148_v22, %v1147_v36 }
 0x1e1   : > { %v1186_v39 = vadd.f32 %v1185_v47, %v1184_v33 }
 0x1e3   : > { %v1188_v52 = vsel %vm1187_vm2, %v1149_v55, %v1186_v39 }
 0x1e4   : > { %1189 = vst [vmem:[%s181_s23] sm:$0x3] %v1188_v52 }
 0x1e5 PF: > { %s14_s12 = sadd.s32 1, %s1354_s12  }
 0x1e6   : > { %p11_p4 = scmp.ge.s32.totalorder %s14_s12, 6  }
 0x1e8   :  { %13 = sbr.rel (!%p11_p4) target bundleno = 1 (0x1), region = 70 }

</bundles_post_ra>
